<compile_context>
chip_gen: v5e
topology: v5e:2x2
jax: 0.10.0
libtpu: 0.0.40
codegen_flags: <defaults>
</compile_context>

<pallas_src>
import functools
import math

import jax
import jax.numpy as jnp
import numpy as np
from jax.experimental import pallas as pl
from jax.experimental.pallas import tpu as pltpu


# ----------------------------- in-kernel helpers -----------------------------

def _layernorm(x, w, b, eps=1e-5):
    mean = jnp.mean(x, axis=-1, keepdims=True)
    var = jnp.mean(jnp.square(x - mean), axis=-1, keepdims=True)
    return (x - mean) * jax.lax.rsqrt(var + eps) * w + b


def _softmax_lastdim(a):
    m = jnp.max(a, axis=-1, keepdims=True)
    p = jnp.exp(a - m)
    s = jnp.sum(p, axis=-1, keepdims=True)
    # EUP approximate reciprocal: moves the divide off the VALU (free slot).
    return p * pl.reciprocal(s, approx=True)


# ------------------------------ fused kernel ---------------------------------

def fused_transformer_kernel(
        x_ref, wte_w_ref, wte_b_ref, wpe_ref,
        ln1w_ref, ln1b_ref, wattn_ref, battn_ref,
        wproj_ref, bproj_ref, ln2w_ref, ln2b_ref,
        wfc_ref, bfc_ref, wfp_ref, bfp_ref,
        lnfw_ref, lnfb_ref, lmw_ref,
        o_ref,
        h_ref,                      # VMEM scratch: resident (T, H) f32 activation
        y_ref,                      # VMEM scratch: (T, H) bf16 attention output
        *, n_head):
    layer = pl.program_id(1)
    num_layers = pl.num_programs(1)
    T, H = h_ref.shape
    hd = H // n_head
    bf16 = jnp.bfloat16

    # ---- layer-0 prologue: fused embedding (Linear(1,H) token emb + pos emb) ----
    @pl.when(layer == 0)
    def _():
        h_ref[...] = x_ref[0] * wte_w_ref[0] + wte_b_ref[0] + wpe_ref[...]

    h = h_ref[...]                                           # (T, H) f32

    # ---- attention branch (weights streamed by BlockSpec for this layer) ----
    h1 = _layernorm(h, ln1w_ref[0], ln1b_ref[0]).astype(bf16)
    # Three lane-aligned matmuls instead of one 3H-wide projection + slicing.
    # 1/sqrt(hd) is already folded into the Q weights/bias at pack time.
    q = (jnp.dot(h1, wattn_ref[0, 0], preferred_element_type=jnp.float32)
         + battn_ref[0, 0]).astype(bf16)
    k = (jnp.dot(h1, wattn_ref[0, 1], preferred_element_type=jnp.float32)
         + battn_ref[0, 1]).astype(bf16)
    v = (jnp.dot(h1, wattn_ref[0, 2], preferred_element_type=jnp.float32)
         + battn_ref[0, 2]).astype(bf16)

    # Per-head attention; each head's output is written directly into its slice
    # of the y_ref scratch (no concat, only one head's score tensor live).
    for hh in range(n_head):
        sl = slice(hh * hd, (hh + 1) * hd)
        att = jnp.einsum('td,sd->ts', q[:, sl], k[:, sl],
                         preferred_element_type=jnp.float32)
        p = _softmax_lastdim(att).astype(bf16)               # NON-causal
        y_ref[:, sl] = jnp.dot(p, v[:, sl],
                               preferred_element_type=jnp.float32).astype(bf16)

    attn_out = (jnp.dot(y_ref[...], wproj_ref[0],
                        preferred_element_type=jnp.float32) + bproj_ref[0])
    h = h + attn_out

    # ---- MLP branch (Sigmoid activation) ----
    h2 = _layernorm(h, ln2w_ref[0], ln2b_ref[0]).astype(bf16)
    m = (jnp.dot(h2, wfc_ref[0], preferred_element_type=jnp.float32)
         + bfc_ref[0])
    m = jax.nn.sigmoid(m).astype(bf16)                       # sigmoid in f32
    m = (jnp.dot(m, wfp_ref[0], preferred_element_type=jnp.float32)
         + bfp_ref[0])
    h = h + m
    h_ref[...] = h                                           # carry to next layer

    # ---- last-layer epilogue: final LN + lm_head on the LAST position only ----
    @pl.when(layer == num_layers - 1)
    def _():
        h_last = _layernorm(h[T - 1:T, :], lnfw_ref[...], lnfb_ref[...])  # (1, H)
        o_ref[0] = jnp.dot(h_last.astype(bf16), lmw_ref[...],
                           preferred_element_type=jnp.float32)            # (1, O_pad)


# -------------------------------- wrapper -------------------------------------

def transformer_forward(x, params, n_head):
    """x: (B, T) scalar 'tokens'; params: raw (PyTorch-equivalent) f32 params."""
    B, T = x.shape
    H = params["wpe"].shape[1]
    O = params["lm_w"].shape[1]
    L = params["w_attn"].shape[0]
    hd = H // n_head
    O_pad = ((O + 127) // 128) * 128          # lane-dense output store
    scale = 1.0 / math.sqrt(hd)
    bf16 = jnp.bfloat16

    x3 = x.astype(jnp.float32)[:, :, None]    # (B, T, 1)

    # --- pack weights for the kernel (would be done once in real use) ---
    w_attn = params["w_attn"].reshape(L, H, 3, H).transpose(0, 2, 1, 3)  # (L,3,H,H)
    w_attn = w_attn.at[:, 0].multiply(scale).astype(bf16)                # fold scale into Q
    b_attn = params["b_attn"].reshape(L, 3, 1, H).at[:, 0].multiply(scale)
    packed = {
        "ln1_w": params["ln1_w"][:, None, :], "ln1_b": params["ln1_b"][:, None, :],
        "w_attn": w_attn, "b_attn": b_attn,
        "w_proj": params["w_proj"].astype(bf16), "b_proj": params["b_proj"][:, None, :],
        "ln2_w": params["ln2_w"][:, None, :], "ln2_b": params["ln2_b"][:, None, :],
        "w_fc": params["w_fc"].astype(bf16), "b_fc": params["b_fc"][:, None, :],
        "w_fp": params["w_fp"].astype(bf16), "b_fp": params["b_fp"][:, None, :],
    }
    lnf_w = params["lnf_w"][None, :]
    lnf_b = params["lnf_b"][None, :]
    lm_w = jnp.pad(params["lm_w"], ((0, 0), (0, O_pad - O))).astype(bf16)

    def const_spec(arr):                      # grid-invariant: single-buffered
        nd = arr.ndim
        return pl.BlockSpec(arr.shape, lambda b, l, _nd=nd: (0,) * _nd,
                            pipeline_mode=pl.Buffered(1))

    def layer_spec(arr):                      # stacked per-layer weight (default 2x buf)
        nd = arr.ndim
        return pl.BlockSpec((1,) + arr.shape[1:],
                            lambda b, l, _nd=nd: (l,) + (0,) * (_nd - 1))

    layer_keys = ("ln1_w", "ln1_b", "w_attn", "b_attn", "w_proj", "b_proj",
                  "ln2_w", "ln2_b", "w_fc", "b_fc", "w_fp", "b_fp")
    head_consts = [params["wte_w"], params["wte_b"], params["wpe"]]
    tail_consts = [lnf_w, lnf_b, lm_w]

    inputs = [x3] + head_consts + [packed[k] for k in layer_keys] + tail_consts
    in_specs = ([pl.BlockSpec((1, T, 1), lambda b, l: (b, 0, 0))]
                + [const_spec(a) for a in head_consts]
                + [layer_spec(packed[k]) for k in layer_keys]
                + [const_spec(a) for a in tail_consts])

    # TODO(synk): at real model widths, tile the 3H/4H weight dims and the vocab
    # dim of lm_w with additional grid axes and set vmem_limit_bytes explicitly.
    out = pl.pallas_call(
        functools.partial(fused_transformer_kernel, n_head=n_head),
        out_shape=jax.ShapeDtypeStruct((B, 1, O_pad), jnp.float32),
        grid=(B, L),                                       # batch parallel, layer inner
        in_specs=in_specs,
        out_specs=pl.BlockSpec((1, 1, O_pad), lambda b, l: (b, 0, 0)),
        scratch_shapes=[pltpu.VMEM((T, H), jnp.float32),   # resident activation
                        pltpu.VMEM((T, H), jnp.bfloat16)], # attention head outputs
        compiler_params=pltpu.CompilerParams(
            dimension_semantics=("parallel", "arbitrary")),
    )(*inputs)
    return out.reshape(B, O_pad)[:, :O]


# ------------------------------ parameter setup --------------------------------

def init_params(key, input_size, hidden_size, output_size, num_layers, n_head):
    """Raw parameters in PyTorch-equivalent layout ([in, out] weights)."""
    H, O, T, L = hidden_size, output_size, input_size, num_layers
    ks = iter(jax.random.split(key, 20))
    nrm = lambda shape: 0.02 * jax.random.normal(next(ks), shape, jnp.float32)
    return {
        "wte_w": nrm((1, H)), "wte_b": nrm((1, H)),           # Linear(1, H)
        "wpe": nrm((T, H)),                                    # Embedding(block_size, H)
        "ln1_w": jnp.ones((L, H), jnp.float32), "ln1_b": jnp.zeros((L, H), jnp.float32),
        "w_attn": nrm((L, H, 3 * H)), "b_attn": nrm((L, 3 * H)),
        "w_proj": nrm((L, H, H)), "b_proj": nrm((L, H)),
        "ln2_w": jnp.ones((L, H), jnp.float32), "ln2_b": jnp.zeros((L, H), jnp.float32),
        "w_fc": nrm((L, H, 4 * H)), "b_fc": nrm((L, 4 * H)),
        "w_fp": nrm((L, 4 * H, H)), "b_fp": nrm((L, H)),
        "lnf_w": jnp.ones((H,), jnp.float32), "lnf_b": jnp.zeros((H,), jnp.float32),
        "lm_w": nrm((H, O)),                                   # lm_head, no bias
    }


# ------------------------------ pure-JAX reference ------------------------------

def _mm(a, w):
    # Same precision policy as the kernel: bf16 operands, f32 accumulation.
    return jnp.dot(a.astype(jnp.bfloat16), w.astype(jnp.bfloat16),
                   preferred_element_type=jnp.float32)


def reference_forward(x, params, n_head):
    B, T = x.shape
    H = params["wpe"].shape[1]
    hd = H // n_head
    L = params["w_attn"].shape[0]
    bf16 = jnp.bfloat16

    def ln(z, w, b, eps=1e-5):
        mu = jnp.mean(z, -1, keepdims=True)
        var = jnp.mean((z - mu) ** 2, -1, keepdims=True)
        return (z - mu) / jnp.sqrt(var + eps) * w + b

    h = (x[:, :, None] * params["wte_w"][0] + params["wte_b"][0]
         + params["wpe"][None, :, :])
    for l in range(L):
        a = ln(h, params["ln1_w"][l], params["ln1_b"][l])
        qkv = _mm(a, params["w_attn"][l]) + params["b_attn"][l]
        q, k, v = jnp.split(qkv, 3, axis=-1)
        q = q.reshape(B, T, n_head, hd).transpose(0, 2, 1, 3)
        k = k.reshape(B, T, n_head, hd).transpose(0, 2, 1, 3)
        v = v.reshape(B, T, n_head, hd).transpose(0, 2, 1, 3)
        att = jnp.einsum("bhqd,bhkd->bhqk", q.astype(bf16), k.astype(bf16),
                         preferred_element_type=jnp.float32) / math.sqrt(hd)
        att = jax.nn.softmax(att, axis=-1)
        y = jnp.einsum("bhqk,bhkd->bhqd", att.astype(bf16), v.astype(bf16),
                       preferred_element_type=jnp.float32)
        y = y.transpose(0, 2, 1, 3).reshape(B, T, H)
        h = h + _mm(y, params["w_proj"][l]) + params["b_proj"][l]
        m = ln(h, params["ln2_w"][l], params["ln2_b"][l])
        m = jax.nn.sigmoid(_mm(m, params["w_fc"][l]) + params["b_fc"][l])
        h = h + _mm(m, params["w_fp"][l]) + params["b_fp"][l]
    h = ln(h, params["lnf_w"], params["lnf_b"])
    logits = _mm(h, params["lm_w"])
    return logits[:, -1, :]


# ----------------------------------- main ---------------------------------------

if __name__ == "__main__":
    input_size = 8          # block_size == sequence length
    hidden_size = 32
    output_size = 16
    num_hidden_layers = 2
    n_head = 4
    batch = 2

    key = jax.random.PRNGKey(0)
    kp, kx = jax.random.split(key)
    params = init_params(kp, input_size, hidden_size, output_size,
                         num_hidden_layers, n_head)
    x = jax.random.normal(kx, (batch, input_size), jnp.float32)  # (B, T) scalar tokens

    out = transformer_forward(x, params, n_head)
    out = jax.block_until_ready(out)

    ref = reference_forward(x, params, n_head)
    # Tolerance covers the EUP approximate reciprocal in softmax and the small
    # rounding difference from folding 1/sqrt(hd) into the bf16 Q weights.
    np.testing.assert_allclose(np.asarray(out), np.asarray(ref),
                               rtol=5e-3, atol=5e-3)

    assert out.shape == (batch, output_size)
    print("KERNEL_OK")
</pallas_src>

<mosaic_0001>
module attributes {stable_mosaic.version = 11 : i64} {
  func.func @fused_transformer_kernel(%arg0: i32, %arg1: i32, %arg2: memref<1x8x1xf32, #tpu.memory_space<vmem>>, %arg3: memref<1x32xf32, #tpu.memory_space<vmem>>, %arg4: memref<1x32xf32, #tpu.memory_space<vmem>>, %arg5: memref<8x32xf32, #tpu.memory_space<vmem>>, %arg6: memref<1x1x32xf32, #tpu.memory_space<vmem>>, %arg7: memref<1x1x32xf32, #tpu.memory_space<vmem>>, %arg8: memref<1x3x32x32xbf16, #tpu.memory_space<vmem>>, %arg9: memref<1x3x1x32xf32, #tpu.memory_space<vmem>>, %arg10: memref<1x32x32xbf16, #tpu.memory_space<vmem>>, %arg11: memref<1x1x32xf32, #tpu.memory_space<vmem>>, %arg12: memref<1x1x32xf32, #tpu.memory_space<vmem>>, %arg13: memref<1x1x32xf32, #tpu.memory_space<vmem>>, %arg14: memref<1x32x128xbf16, #tpu.memory_space<vmem>>, %arg15: memref<1x1x128xf32, #tpu.memory_space<vmem>>, %arg16: memref<1x128x32xbf16, #tpu.memory_space<vmem>>, %arg17: memref<1x1x32xf32, #tpu.memory_space<vmem>>, %arg18: memref<1x32xf32, #tpu.memory_space<vmem>>, %arg19: memref<1x32xf32, #tpu.memory_space<vmem>>, %arg20: memref<32x128xbf16, #tpu.memory_space<vmem>>, %arg21: memref<1x1x128xf32, #tpu.memory_space<vmem>>, %arg22: memref<8x32xf32, #tpu.memory_space<vmem>>, %arg23: memref<8x32xbf16, #tpu.memory_space<vmem>>) attributes {dimension_semantics = [#tpu.dimension_semantics<parallel>, #tpu.dimension_semantics<arbitrary>], iteration_bounds = array<i64: 2, 2>, scalar_prefetch = 0 : i64, scratch_operands = 2 : i64, tpu.core_type = #tpu.core_type<tc>, window_params = [{transform_indices = @transform_0, window_bounds = array<i64: 1, 8, 1>}, {pipeline_mode = #tpu.pipeline_mode<synchronous>, transform_indices = @transform_1, window_bounds = array<i64: 1, 32>}, {pipeline_mode = #tpu.pipeline_mode<synchronous>, transform_indices = @transform_2, window_bounds = array<i64: 1, 32>}, {pipeline_mode = #tpu.pipeline_mode<synchronous>, transform_indices = @transform_3, window_bounds = array<i64: 8, 32>}, {transform_indices = @transform_4, window_bounds = array<i64: 1, 1, 32>}, {transform_indices = @transform_5, window_bounds = array<i64: 1, 1, 32>}, {transform_indices = @transform_6, window_bounds = array<i64: 1, 3, 32, 32>}, {transform_indices = @transform_7, window_bounds = array<i64: 1, 3, 1, 32>}, {transform_indices = @transform_8, window_bounds = array<i64: 1, 32, 32>}, {transform_indices = @transform_9, window_bounds = array<i64: 1, 1, 32>}, {transform_indices = @transform_10, window_bounds = array<i64: 1, 1, 32>}, {transform_indices = @transform_11, window_bounds = array<i64: 1, 1, 32>}, {transform_indices = @transform_12, window_bounds = array<i64: 1, 32, 128>}, {transform_indices = @transform_13, window_bounds = array<i64: 1, 1, 128>}, {transform_indices = @transform_14, window_bounds = array<i64: 1, 128, 32>}, {transform_indices = @transform_15, window_bounds = array<i64: 1, 1, 32>}, {pipeline_mode = #tpu.pipeline_mode<synchronous>, transform_indices = @transform_16, window_bounds = array<i64: 1, 32>}, {pipeline_mode = #tpu.pipeline_mode<synchronous>, transform_indices = @transform_17, window_bounds = array<i64: 1, 32>}, {pipeline_mode = #tpu.pipeline_mode<synchronous>, transform_indices = @transform_18, window_bounds = array<i64: 32, 128>}, {transform_indices = @transform_19, window_bounds = array<i64: 1, 1, 128>}]} {
    %c0_i32 = arith.constant 0 : i32
    %0 = arith.cmpi eq, %arg1, %c0_i32 : i32
    %1 = arith.extui %0 : i1 to i32
    %c0_i32_0 = arith.constant 0 : i32
    %2 = arith.cmpi ne, %1, %c0_i32_0 : i32
    scf.if %2 {
      %c0_96 = arith.constant 0 : index
      %c0_97 = arith.constant 0 : index
      %c0_98 = arith.constant 0 : index
      %188 = vector.load %arg2[%c0_96, %c0_97, %c0_98] : memref<1x8x1xf32, #tpu.memory_space<vmem>>, vector<1x8x1xf32>
      %189 = vector.shape_cast %188 : vector<1x8x1xf32> to vector<8x1xf32>
      %c0_99 = arith.constant 0 : index
      %c0_100 = arith.constant 0 : index
      %190 = vector.load %arg3[%c0_99, %c0_100] : memref<1x32xf32, #tpu.memory_space<vmem>>, vector<1x32xf32>
      %191 = vector.shape_cast %190 : vector<1x32xf32> to vector<32xf32>
      %192 = vector.shape_cast %191 : vector<32xf32> to vector<1x32xf32>
      %193 = vector.broadcast %189 : vector<8x1xf32> to vector<8x32xf32>
      %194 = vector.broadcast %192 : vector<1x32xf32> to vector<8x32xf32>
      %195 = arith.mulf %193, %194 : vector<8x32xf32>
      %c0_101 = arith.constant 0 : index
      %c0_102 = arith.constant 0 : index
      %196 = vector.load %arg4[%c0_101, %c0_102] : memref<1x32xf32, #tpu.memory_space<vmem>>, vector<1x32xf32>
      %197 = vector.shape_cast %196 : vector<1x32xf32> to vector<32xf32>
      %198 = vector.shape_cast %197 : vector<32xf32> to vector<1x32xf32>
      %199 = vector.broadcast %198 : vector<1x32xf32> to vector<8x32xf32>
      %200 = arith.addf %195, %199 : vector<8x32xf32>
      %c0_103 = arith.constant 0 : index
      %c0_104 = arith.constant 0 : index
      %201 = vector.load %arg5[%c0_103, %c0_104] : memref<8x32xf32, #tpu.memory_space<vmem>>, vector<8x32xf32>
      %202 = arith.addf %200, %201 : vector<8x32xf32>
      %c0_105 = arith.constant 0 : index
      %c0_106 = arith.constant 0 : index
      %203 = vector.load %arg22[%c0_105, %c0_106] : memref<8x32xf32, #tpu.memory_space<vmem>>, vector<8x32xf32>
      tpu.vector_store %arg22[%c0_105, %c0_106], %202 {strides = array<i32>} : memref<8x32xf32, #tpu.memory_space<vmem>>, vector<8x32xf32>,
    } else {
    }
    %c0 = arith.constant 0 : index
    %c0_1 = arith.constant 0 : index
    %3 = vector.load %arg22[%c0, %c0_1] : memref<8x32xf32, #tpu.memory_space<vmem>>, vector<8x32xf32>
    %c0_2 = arith.constant 0 : index
    %c0_3 = arith.constant 0 : index
    %c0_4 = arith.constant 0 : index
    %4 = vector.load %arg6[%c0_2, %c0_3, %c0_4] : memref<1x1x32xf32, #tpu.memory_space<vmem>>, vector<1x1x32xf32>
    %5 = vector.shape_cast %4 : vector<1x1x32xf32> to vector<1x32xf32>
    %c0_5 = arith.constant 0 : index
    %c0_6 = arith.constant 0 : index
    %c0_7 = arith.constant 0 : index
    %6 = vector.load %arg7[%c0_5, %c0_6, %c0_7] : memref<1x1x32xf32, #tpu.memory_space<vmem>>, vector<1x1x32xf32>
    %7 = vector.shape_cast %6 : vector<1x1x32xf32> to vector<1x32xf32>
    %cst = arith.constant dense<0.000000e+00> : vector<8xf32>
    %8 = vector.multi_reduction <add>, %3, %cst [1] : vector<8x32xf32> to vector<8xf32>
    %9 = vector.shape_cast %8 : vector<8xf32> to vector<8x1xf32>
    %cst_8 = arith.constant 3.200000e+01 : f32
    %10 = vector.broadcast %cst_8 : f32 to vector<8x1xf32>
    %11 = arith.divf %9, %10 : vector<8x1xf32>
    %12 = vector.broadcast %11 : vector<8x1xf32> to vector<8x32xf32>
    %13 = arith.subf %3, %12 : vector<8x32xf32>
    %14 = arith.mulf %13, %13 : vector<8x32xf32>
    %cst_9 = arith.constant dense<0.000000e+00> : vector<8xf32>
    %15 = vector.multi_reduction <add>, %14, %cst_9 [1] : vector<8x32xf32> to vector<8xf32>
    %16 = vector.shape_cast %15 : vector<8xf32> to vector<8x1xf32>
    %cst_10 = arith.constant 3.200000e+01 : f32
    %17 = vector.broadcast %cst_10 : f32 to vector<8x1xf32>
    %18 = arith.divf %16, %17 : vector<8x1xf32>
    %19 = vector.broadcast %11 : vector<8x1xf32> to vector<8x32xf32>
    %20 = arith.subf %3, %19 : vector<8x32xf32>
    %cst_11 = arith.constant 9.99999974E-6 : f32
    %21 = vector.broadcast %cst_11 : f32 to vector<8x1xf32>
    %22 = arith.addf %18, %21 : vector<8x1xf32>
    %23 = math.rsqrt %22 : vector<8x1xf32>
    %24 = vector.broadcast %23 : vector<8x1xf32> to vector<8x32xf32>
    %25 = arith.mulf %20, %24 : vector<8x32xf32>
    %26 = vector.broadcast %5 : vector<1x32xf32> to vector<8x32xf32>
    %27 = arith.mulf %25, %26 : vector<8x32xf32>
    %28 = vector.broadcast %7 : vector<1x32xf32> to vector<8x32xf32>
    %29 = arith.addf %27, %28 : vector<8x32xf32>
    %30 = arith.truncf %29 : vector<8x32xf32> to vector<8x32xbf16>
    %c0_12 = arith.constant 0 : index
    %c0_13 = arith.constant 0 : index
    %c0_14 = arith.constant 0 : index
    %c0_15 = arith.constant 0 : index
    %31 = vector.load %arg8[%c0_12, %c0_13, %c0_14, %c0_15] : memref<1x3x32x32xbf16, #tpu.memory_space<vmem>>, vector<1x1x32x32xbf16>
    %32 = vector.shape_cast %31 : vector<1x1x32x32xbf16> to vector<32x32xbf16>
    %cst_16 = arith.constant dense<0.000000e+00> : vector<8x32xf32>
    %33 = tpu.matmul %30, %32, %cst_16 {dimension_numbers = #tpu.dot_dimension_numbers<[1], [0], [0], [1], [0, 0, 1, 1], [], []>} : vector<8x32xbf16>, vector<32x32xbf16>, vector<8x32xf32> -> vector<8x32xf32>
    %c0_17 = arith.constant 0 : index
    %c0_18 = arith.constant 0 : index
    %c0_19 = arith.constant 0 : index
    %c0_20 = arith.constant 0 : index
    %34 = vector.load %arg9[%c0_17, %c0_18, %c0_19, %c0_20] : memref<1x3x1x32xf32, #tpu.memory_space<vmem>>, vector<1x1x1x32xf32>
    %35 = vector.shape_cast %34 : vector<1x1x1x32xf32> to vector<1x32xf32>
    %36 = vector.broadcast %35 : vector<1x32xf32> to vector<8x32xf32>
    %37 = arith.addf %33, %36 : vector<8x32xf32>
    %38 = arith.truncf %37 : vector<8x32xf32> to vector<8x32xbf16>
    %c0_21 = arith.constant 0 : index
    %c1 = arith.constant 1 : index
    %c0_22 = arith.constant 0 : index
    %c0_23 = arith.constant 0 : index
    %39 = vector.load %arg8[%c0_21, %c1, %c0_22, %c0_23] : memref<1x3x32x32xbf16, #tpu.memory_space<vmem>>, vector<1x1x32x32xbf16>
    %40 = vector.shape_cast %39 : vector<1x1x32x32xbf16> to vector<32x32xbf16>
    %cst_24 = arith.constant dense<0.000000e+00> : vector<8x32xf32>
    %41 = tpu.matmul %30, %40, %cst_24 {dimension_numbers = #tpu.dot_dimension_numbers<[1], [0], [0], [1], [0, 0, 1, 1], [], []>} : vector<8x32xbf16>, vector<32x32xbf16>, vector<8x32xf32> -> vector<8x32xf32>
    %c0_25 = arith.constant 0 : index
    %c1_26 = arith.constant 1 : index
    %c0_27 = arith.constant 0 : index
    %c0_28 = arith.constant 0 : index
    %42 = vector.load %arg9[%c0_25, %c1_26, %c0_27, %c0_28] : memref<1x3x1x32xf32, #tpu.memory_space<vmem>>, vector<1x1x1x32xf32>
    %43 = vector.shape_cast %42 : vector<1x1x1x32xf32> to vector<1x32xf32>
    %44 = vector.broadcast %43 : vector<1x32xf32> to vector<8x32xf32>
    %45 = arith.addf %41, %44 : vector<8x32xf32>
    %46 = arith.truncf %45 : vector<8x32xf32> to vector<8x32xbf16>
    %c0_29 = arith.constant 0 : index
    %c2 = arith.constant 2 : index
    %c0_30 = arith.constant 0 : index
    %c0_31 = arith.constant 0 : index
    %47 = vector.load %arg8[%c0_29, %c2, %c0_30, %c0_31] : memref<1x3x32x32xbf16, #tpu.memory_space<vmem>>, vector<1x1x32x32xbf16>
    %48 = vector.shape_cast %47 : vector<1x1x32x32xbf16> to vector<32x32xbf16>
    %cst_32 = arith.constant dense<0.000000e+00> : vector<8x32xf32>
    %49 = tpu.matmul %30, %48, %cst_32 {dimension_numbers = #tpu.dot_dimension_numbers<[1], [0], [0], [1], [0, 0, 1, 1], [], []>} : vector<8x32xbf16>, vector<32x32xbf16>, vector<8x32xf32> -> vector<8x32xf32>
    %c0_33 = arith.constant 0 : index
    %c2_34 = arith.constant 2 : index
    %c0_35 = arith.constant 0 : index
    %c0_36 = arith.constant 0 : index
    %50 = vector.load %arg9[%c0_33, %c2_34, %c0_35, %c0_36] : memref<1x3x1x32xf32, #tpu.memory_space<vmem>>, vector<1x1x1x32xf32>
    %51 = vector.shape_cast %50 : vector<1x1x1x32xf32> to vector<1x32xf32>
    %52 = vector.broadcast %51 : vector<1x32xf32> to vector<8x32xf32>
    %53 = arith.addf %49, %52 : vector<8x32xf32>
    %54 = arith.truncf %53 : vector<8x32xf32> to vector<8x32xbf16>
    %55 = vector.extract_strided_slice %38 {offsets = [0, 0], sizes = [8, 8], strides = [1, 1]} : vector<8x32xbf16> to vector<8x8xbf16>
    %56 = vector.extract_strided_slice %46 {offsets = [0, 0], sizes = [8, 8], strides = [1, 1]} : vector<8x32xbf16> to vector<8x8xbf16>
    "tpu.trace_start"() <{level = 10 : i32, message = "td,sd->ts"}> : () -> ()
    %cst_37 = arith.constant dense<0.000000e+00> : vector<8x8xf32>
    %57 = tpu.matmul %55, %56, %cst_37 {dimension_numbers = #tpu.dot_dimension_numbers<[1], [1], [0], [0], [0, 0, 1, 0], [], []>} : vector<8x8xbf16>, vector<8x8xbf16>, vector<8x8xf32> -> vector<8x8xf32>
    "tpu.trace_stop"() : () -> ()
    %cst_38 = arith.constant dense<0xFF800000> : vector<8xf32>
    %58 = vector.multi_reduction <maximumf>, %57, %cst_38 [1] : vector<8x8xf32> to vector<8xf32>
    %59 = vector.shape_cast %58 : vector<8xf32> to vector<8x1xf32>
    %60 = vector.broadcast %59 : vector<8x1xf32> to vector<8x8xf32>
    %61 = arith.subf %57, %60 : vector<8x8xf32>
    %62 = math.exp %61 : vector<8x8xf32>
    %cst_39 = arith.constant dense<0.000000e+00> : vector<8xf32>
    %63 = vector.multi_reduction <add>, %62, %cst_39 [1] : vector<8x8xf32> to vector<8xf32>
    %64 = vector.shape_cast %63 : vector<8xf32> to vector<8x1xf32>
    %65 = tpu.reciprocal %64 {approx = true} : vector<8x1xf32> -> vector<8x1xf32>
    %66 = vector.broadcast %65 : vector<8x1xf32> to vector<8x8xf32>
    %67 = arith.mulf %62, %66 : vector<8x8xf32>
    %68 = arith.truncf %67 : vector<8x8xf32> to vector<8x8xbf16>
    %69 = vector.extract_strided_slice %54 {offsets = [0, 0], sizes = [8, 8], strides = [1, 1]} : vector<8x32xbf16> to vector<8x8xbf16>
    %cst_40 = arith.constant dense<0.000000e+00> : vector<8x8xf32>
    %70 = tpu.matmul %68, %69, %cst_40 {dimension_numbers = #tpu.dot_dimension_numbers<[1], [0], [0], [1], [0, 0, 1, 1], [], []>} : vector<8x8xbf16>, vector<8x8xbf16>, vector<8x8xf32> -> vector<8x8xf32>
    %71 = arith.truncf %70 : vector<8x8xf32> to vector<8x8xbf16>
    %c0_41 = arith.constant 0 : index
    %c0_42 = arith.constant 0 : index
    %72 = vector.load %arg23[%c0_41, %c0_42] : memref<8x32xbf16, #tpu.memory_space<vmem>>, vector<8x8xbf16>
    tpu.vector_store %arg23[%c0_41, %c0_42], %71 {strides = array<i32>} : memref<8x32xbf16, #tpu.memory_space<vmem>>, vector<8x8xbf16>,
    %73 = vector.extract_strided_slice %38 {offsets = [0, 8], sizes = [8, 8], strides = [1, 1]} : vector<8x32xbf16> to vector<8x8xbf16>
    %74 = vector.extract_strided_slice %46 {offsets = [0, 8], sizes = [8, 8], strides = [1, 1]} : vector<8x32xbf16> to vector<8x8xbf16>
    "tpu.trace_start"() <{level = 10 : i32, message = "td,sd->ts"}> : () -> ()
    %cst_43 = arith.constant dense<0.000000e+00> : vector<8x8xf32>
    %75 = tpu.matmul %73, %74, %cst_43 {dimension_numbers = #tpu.dot_dimension_numbers<[1], [1], [0], [0], [0, 0, 1, 0], [], []>} : vector<8x8xbf16>, vector<8x8xbf16>, vector<8x8xf32> -> vector<8x8xf32>
    "tpu.trace_stop"() : () -> ()
    %cst_44 = arith.constant dense<0xFF800000> : vector<8xf32>
    %76 = vector.multi_reduction <maximumf>, %75, %cst_44 [1] : vector<8x8xf32> to vector<8xf32>
    %77 = vector.shape_cast %76 : vector<8xf32> to vector<8x1xf32>
    %78 = vector.broadcast %77 : vector<8x1xf32> to vector<8x8xf32>
    %79 = arith.subf %75, %78 : vector<8x8xf32>
    %80 = math.exp %79 : vector<8x8xf32>
    %cst_45 = arith.constant dense<0.000000e+00> : vector<8xf32>
    %81 = vector.multi_reduction <add>, %80, %cst_45 [1] : vector<8x8xf32> to vector<8xf32>
    %82 = vector.shape_cast %81 : vector<8xf32> to vector<8x1xf32>
    %83 = tpu.reciprocal %82 {approx = true} : vector<8x1xf32> -> vector<8x1xf32>
    %84 = vector.broadcast %83 : vector<8x1xf32> to vector<8x8xf32>
    %85 = arith.mulf %80, %84 : vector<8x8xf32>
    %86 = arith.truncf %85 : vector<8x8xf32> to vector<8x8xbf16>
    %87 = vector.extract_strided_slice %54 {offsets = [0, 8], sizes = [8, 8], strides = [1, 1]} : vector<8x32xbf16> to vector<8x8xbf16>
    %cst_46 = arith.constant dense<0.000000e+00> : vector<8x8xf32>
    %88 = tpu.matmul %86, %87, %cst_46 {dimension_numbers = #tpu.dot_dimension_numbers<[1], [0], [0], [1], [0, 0, 1, 1], [], []>} : vector<8x8xbf16>, vector<8x8xbf16>, vector<8x8xf32> -> vector<8x8xf32>
    %89 = arith.truncf %88 : vector<8x8xf32> to vector<8x8xbf16>
    %c0_47 = arith.constant 0 : index
    %c8 = arith.constant 8 : index
    %90 = vector.load %arg23[%c0_47, %c8] : memref<8x32xbf16, #tpu.memory_space<vmem>>, vector<8x8xbf16>
    tpu.vector_store %arg23[%c0_47, %c8], %89 {strides = array<i32>} : memref<8x32xbf16, #tpu.memory_space<vmem>>, vector<8x8xbf16>,
    %91 = vector.extract_strided_slice %38 {offsets = [0, 16], sizes = [8, 8], strides = [1, 1]} : vector<8x32xbf16> to vector<8x8xbf16>
    %92 = vector.extract_strided_slice %46 {offsets = [0, 16], sizes = [8, 8], strides = [1, 1]} : vector<8x32xbf16> to vector<8x8xbf16>
    "tpu.trace_start"() <{level = 10 : i32, message = "td,sd->ts"}> : () -> ()
    %cst_48 = arith.constant dense<0.000000e+00> : vector<8x8xf32>
    %93 = tpu.matmul %91, %92, %cst_48 {dimension_numbers = #tpu.dot_dimension_numbers<[1], [1], [0], [0], [0, 0, 1, 0], [], []>} : vector<8x8xbf16>, vector<8x8xbf16>, vector<8x8xf32> -> vector<8x8xf32>
    "tpu.trace_stop"() : () -> ()
    %cst_49 = arith.constant dense<0xFF800000> : vector<8xf32>
    %94 = vector.multi_reduction <maximumf>, %93, %cst_49 [1] : vector<8x8xf32> to vector<8xf32>
    %95 = vector.shape_cast %94 : vector<8xf32> to vector<8x1xf32>
    %96 = vector.broadcast %95 : vector<8x1xf32> to vector<8x8xf32>
    %97 = arith.subf %93, %96 : vector<8x8xf32>
    %98 = math.exp %97 : vector<8x8xf32>
    %cst_50 = arith.constant dense<0.000000e+00> : vector<8xf32>
    %99 = vector.multi_reduction <add>, %98, %cst_50 [1] : vector<8x8xf32> to vector<8xf32>
    %100 = vector.shape_cast %99 : vector<8xf32> to vector<8x1xf32>
    %101 = tpu.reciprocal %100 {approx = true} : vector<8x1xf32> -> vector<8x1xf32>
    %102 = vector.broadcast %101 : vector<8x1xf32> to vector<8x8xf32>
    %103 = arith.mulf %98, %102 : vector<8x8xf32>
    %104 = arith.truncf %103 : vector<8x8xf32> to vector<8x8xbf16>
    %105 = vector.extract_strided_slice %54 {offsets = [0, 16], sizes = [8, 8], strides = [1, 1]} : vector<8x32xbf16> to vector<8x8xbf16>
    %cst_51 = arith.constant dense<0.000000e+00> : vector<8x8xf32>
    %106 = tpu.matmul %104, %105, %cst_51 {dimension_numbers = #tpu.dot_dimension_numbers<[1], [0], [0], [1], [0, 0, 1, 1], [], []>} : vector<8x8xbf16>, vector<8x8xbf16>, vector<8x8xf32> -> vector<8x8xf32>
    %107 = arith.truncf %106 : vector<8x8xf32> to vector<8x8xbf16>
    %c0_52 = arith.constant 0 : index
    %c16 = arith.constant 16 : index
    %108 = vector.load %arg23[%c0_52, %c16] : memref<8x32xbf16, #tpu.memory_space<vmem>>, vector<8x8xbf16>
    tpu.vector_store %arg23[%c0_52, %c16], %107 {strides = array<i32>} : memref<8x32xbf16, #tpu.memory_space<vmem>>, vector<8x8xbf16>,
    %109 = vector.extract_strided_slice %38 {offsets = [0, 24], sizes = [8, 8], strides = [1, 1]} : vector<8x32xbf16> to vector<8x8xbf16>
    %110 = vector.extract_strided_slice %46 {offsets = [0, 24], sizes = [8, 8], strides = [1, 1]} : vector<8x32xbf16> to vector<8x8xbf16>
    "tpu.trace_start"() <{level = 10 : i32, message = "td,sd->ts"}> : () -> ()
    %cst_53 = arith.constant dense<0.000000e+00> : vector<8x8xf32>
    %111 = tpu.matmul %109, %110, %cst_53 {dimension_numbers = #tpu.dot_dimension_numbers<[1], [1], [0], [0], [0, 0, 1, 0], [], []>} : vector<8x8xbf16>, vector<8x8xbf16>, vector<8x8xf32> -> vector<8x8xf32>
    "tpu.trace_stop"() : () -> ()
    %cst_54 = arith.constant dense<0xFF800000> : vector<8xf32>
    %112 = vector.multi_reduction <maximumf>, %111, %cst_54 [1] : vector<8x8xf32> to vector<8xf32>
    %113 = vector.shape_cast %112 : vector<8xf32> to vector<8x1xf32>
    %114 = vector.broadcast %113 : vector<8x1xf32> to vector<8x8xf32>
    %115 = arith.subf %111, %114 : vector<8x8xf32>
    %116 = math.exp %115 : vector<8x8xf32>
    %cst_55 = arith.constant dense<0.000000e+00> : vector<8xf32>
    %117 = vector.multi_reduction <add>, %116, %cst_55 [1] : vector<8x8xf32> to vector<8xf32>
    %118 = vector.shape_cast %117 : vector<8xf32> to vector<8x1xf32>
    %119 = tpu.reciprocal %118 {approx = true} : vector<8x1xf32> -> vector<8x1xf32>
    %120 = vector.broadcast %119 : vector<8x1xf32> to vector<8x8xf32>
    %121 = arith.mulf %116, %120 : vector<8x8xf32>
    %122 = arith.truncf %121 : vector<8x8xf32> to vector<8x8xbf16>
    %123 = vector.extract_strided_slice %54 {offsets = [0, 24], sizes = [8, 8], strides = [1, 1]} : vector<8x32xbf16> to vector<8x8xbf16>
    %cst_56 = arith.constant dense<0.000000e+00> : vector<8x8xf32>
    %124 = tpu.matmul %122, %123, %cst_56 {dimension_numbers = #tpu.dot_dimension_numbers<[1], [0], [0], [1], [0, 0, 1, 1], [], []>} : vector<8x8xbf16>, vector<8x8xbf16>, vector<8x8xf32> -> vector<8x8xf32>
    %125 = arith.truncf %124 : vector<8x8xf32> to vector<8x8xbf16>
    %c0_57 = arith.constant 0 : index
    %c24 = arith.constant 24 : index
    %126 = vector.load %arg23[%c0_57, %c24] : memref<8x32xbf16, #tpu.memory_space<vmem>>, vector<8x8xbf16>
    tpu.vector_store %arg23[%c0_57, %c24], %125 {strides = array<i32>} : memref<8x32xbf16, #tpu.memory_space<vmem>>, vector<8x8xbf16>,
    %c0_58 = arith.constant 0 : index
    %c0_59 = arith.constant 0 : index
    %127 = vector.load %arg23[%c0_58, %c0_59] : memref<8x32xbf16, #tpu.memory_space<vmem>>, vector<8x32xbf16>
    %c0_60 = arith.constant 0 : index
    %c0_61 = arith.constant 0 : index
    %c0_62 = arith.constant 0 : index
    %128 = vector.load %arg10[%c0_60, %c0_61, %c0_62] : memref<1x32x32xbf16, #tpu.memory_space<vmem>>, vector<1x32x32xbf16>
    %129 = vector.shape_cast %128 : vector<1x32x32xbf16> to vector<32x32xbf16>
    %cst_63 = arith.constant dense<0.000000e+00> : vector<8x32xf32>
    %130 = tpu.matmul %127, %129, %cst_63 {dimension_numbers = #tpu.dot_dimension_numbers<[1], [0], [0], [1], [0, 0, 1, 1], [], []>} : vector<8x32xbf16>, vector<32x32xbf16>, vector<8x32xf32> -> vector<8x32xf32>
    %c0_64 = arith.constant 0 : index
    %c0_65 = arith.constant 0 : index
    %c0_66 = arith.constant 0 : index
    %131 = vector.load %arg11[%c0_64, %c0_65, %c0_66] : memref<1x1x32xf32, #tpu.memory_space<vmem>>, vector<1x1x32xf32>
    %132 = vector.shape_cast %131 : vector<1x1x32xf32> to vector<1x32xf32>
    %133 = vector.broadcast %132 : vector<1x32xf32> to vector<8x32xf32>
    %134 = arith.addf %130, %133 : vector<8x32xf32>
    %135 = arith.addf %3, %134 : vector<8x32xf32>
    %c0_67 = arith.constant 0 : index
    %c0_68 = arith.constant 0 : index
    %c0_69 = arith.constant 0 : index
    %136 = vector.load %arg12[%c0_67, %c0_68, %c0_69] : memref<1x1x32xf32, #tpu.memory_space<vmem>>, vector<1x1x32xf32>
    %137 = vector.shape_cast %136 : vector<1x1x32xf32> to vector<1x32xf32>
    %c0_70 = arith.constant 0 : index
    %c0_71 = arith.constant 0 : index
    %c0_72 = arith.constant 0 : index
    %138 = vector.load %arg13[%c0_70, %c0_71, %c0_72] : memref<1x1x32xf32, #tpu.memory_space<vmem>>, vector<1x1x32xf32>
    %139 = vector.shape_cast %138 : vector<1x1x32xf32> to vector<1x32xf32>
    %cst_73 = arith.constant dense<0.000000e+00> : vector<8xf32>
    %140 = vector.multi_reduction <add>, %135, %cst_73 [1] : vector<8x32xf32> to vector<8xf32>
    %141 = vector.shape_cast %140 : vector<8xf32> to vector<8x1xf32>
    %cst_74 = arith.constant 3.200000e+01 : f32
    %142 = vector.broadcast %cst_74 : f32 to vector<8x1xf32>
    %143 = arith.divf %141, %142 : vector<8x1xf32>
    %144 = vector.broadcast %143 : vector<8x1xf32> to vector<8x32xf32>
    %145 = arith.subf %135, %144 : vector<8x32xf32>
    %146 = arith.mulf %145, %145 : vector<8x32xf32>
    %cst_75 = arith.constant dense<0.000000e+00> : vector<8xf32>
    %147 = vector.multi_reduction <add>, %146, %cst_75 [1] : vector<8x32xf32> to vector<8xf32>
    %148 = vector.shape_cast %147 : vector<8xf32> to vector<8x1xf32>
    %cst_76 = arith.constant 3.200000e+01 : f32
    %149 = vector.broadcast %cst_76 : f32 to vector<8x1xf32>
    %150 = arith.divf %148, %149 : vector<8x1xf32>
    %151 = vector.broadcast %143 : vector<8x1xf32> to vector<8x32xf32>
    %152 = arith.subf %135, %151 : vector<8x32xf32>
    %cst_77 = arith.constant 9.99999974E-6 : f32
    %153 = vector.broadcast %cst_77 : f32 to vector<8x1xf32>
    %154 = arith.addf %150, %153 : vector<8x1xf32>
    %155 = math.rsqrt %154 : vector<8x1xf32>
    %156 = vector.broadcast %155 : vector<8x1xf32> to vector<8x32xf32>
    %157 = arith.mulf %152, %156 : vector<8x32xf32>
    %158 = vector.broadcast %137 : vector<1x32xf32> to vector<8x32xf32>
    %159 = arith.mulf %157, %158 : vector<8x32xf32>
    %160 = vector.broadcast %139 : vector<1x32xf32> to vector<8x32xf32>
    %161 = arith.addf %159, %160 : vector<8x32xf32>
    %162 = arith.truncf %161 : vector<8x32xf32> to vector<8x32xbf16>
    %c0_78 = arith.constant 0 : index
    %c0_79 = arith.constant 0 : index
    %c0_80 = arith.constant 0 : index
    %163 = vector.load %arg14[%c0_78, %c0_79, %c0_80] : memref<1x32x128xbf16, #tpu.memory_space<vmem>>, vector<1x32x128xbf16>
    %164 = vector.shape_cast %163 : vector<1x32x128xbf16> to vector<32x128xbf16>
    %cst_81 = arith.constant dense<0.000000e+00> : vector<8x128xf32>
    %165 = tpu.matmul %162, %164, %cst_81 {dimension_numbers = #tpu.dot_dimension_numbers<[1], [0], [0], [1], [0, 0, 1, 1], [], []>} : vector<8x32xbf16>, vector<32x128xbf16>, vector<8x128xf32> -> vector<8x128xf32>
    %c0_82 = arith.constant 0 : index
    %c0_83 = arith.constant 0 : index
    %c0_84 = arith.constant 0 : index
    %166 = vector.load %arg15[%c0_82, %c0_83, %c0_84] : memref<1x1x128xf32, #tpu.memory_space<vmem>>, vector<1x1x128xf32>
    %167 = vector.shape_cast %166 : vector<1x1x128xf32> to vector<1x128xf32>
    %168 = vector.broadcast %167 : vector<1x128xf32> to vector<8x128xf32>
    %169 = arith.addf %165, %168 : vector<8x128xf32>
    %170 = arith.negf %169 : vector<8x128xf32>
    %171 = math.exp %170 : vector<8x128xf32>
    %cst_85 = arith.constant 1.000000e+00 : f32
    %172 = vector.broadcast %cst_85 : f32 to vector<8x128xf32>
    %173 = arith.addf %172, %171 : vector<8x128xf32>
    %174 = arith.divf %172, %173 : vector<8x128xf32>
    %175 = arith.truncf %174 : vector<8x128xf32> to vector<8x128xbf16>
    %c0_86 = arith.constant 0 : index
    %c0_87 = arith.constant 0 : index
    %c0_88 = arith.constant 0 : index
    %176 = vector.load %arg16[%c0_86, %c0_87, %c0_88] : memref<1x128x32xbf16, #tpu.memory_space<vmem>>, vector<1x128x32xbf16>
    %177 = vector.shape_cast %176 : vector<1x128x32xbf16> to vector<128x32xbf16>
    %cst_89 = arith.constant dense<0.000000e+00> : vector<8x32xf32>
    %178 = tpu.matmul %175, %177, %cst_89 {dimension_numbers = #tpu.dot_dimension_numbers<[1], [0], [0], [1], [0, 0, 1, 1], [], []>} : vector<8x128xbf16>, vector<128x32xbf16>, vector<8x32xf32> -> vector<8x32xf32>
    %c0_90 = arith.constant 0 : index
    %c0_91 = arith.constant 0 : index
    %c0_92 = arith.constant 0 : index
    %179 = vector.load %arg17[%c0_90, %c0_91, %c0_92] : memref<1x1x32xf32, #tpu.memory_space<vmem>>, vector<1x1x32xf32>
    %180 = vector.shape_cast %179 : vector<1x1x32xf32> to vector<1x32xf32>
    %181 = vector.broadcast %180 : vector<1x32xf32> to vector<8x32xf32>
    %182 = arith.addf %178, %181 : vector<8x32xf32>
    %183 = arith.addf %135, %182 : vector<8x32xf32>
    %c0_93 = arith.constant 0 : index
    %c0_94 = arith.constant 0 : index
    %184 = vector.load %arg22[%c0_93, %c0_94] : memref<8x32xf32, #tpu.memory_space<vmem>>, vector<8x32xf32>
    tpu.vector_store %arg22[%c0_93, %c0_94], %183 {strides = array<i32>} : memref<8x32xf32, #tpu.memory_space<vmem>>, vector<8x32xf32>,
    %c1_i32 = arith.constant 1 : i32
    %185 = arith.cmpi eq, %arg1, %c1_i32 : i32
    %186 = arith.extui %185 : i1 to i32
    %c0_i32_95 = arith.constant 0 : i32
    %187 = arith.cmpi ne, %186, %c0_i32_95 : i32
    scf.if %187 {
      %188 = vector.extract_strided_slice %183 {offsets = [7, 0], sizes = [1, 32], strides = [1, 1]} : vector<8x32xf32> to vector<1x32xf32>
      %c0_96 = arith.constant 0 : index
      %c0_97 = arith.constant 0 : index
      %189 = vector.load %arg18[%c0_96, %c0_97] : memref<1x32xf32, #tpu.memory_space<vmem>>, vector<1x32xf32>
      %c0_98 = arith.constant 0 : index
      %c0_99 = arith.constant 0 : index
      %190 = vector.load %arg19[%c0_98, %c0_99] : memref<1x32xf32, #tpu.memory_space<vmem>>, vector<1x32xf32>
      %cst_100 = arith.constant dense<0.000000e+00> : vector<1xf32>
      %191 = vector.multi_reduction <add>, %188, %cst_100 [1] : vector<1x32xf32> to vector<1xf32>
      %192 = vector.shape_cast %191 : vector<1xf32> to vector<1x1xf32>
      %cst_101 = arith.constant 3.200000e+01 : f32
      %193 = vector.broadcast %cst_101 : f32 to vector<1x1xf32>
      %194 = arith.divf %192, %193 : vector<1x1xf32>
      %195 = vector.broadcast %194 : vector<1x1xf32> to vector<1x32xf32>
      %196 = arith.subf %188, %195 : vector<1x32xf32>
      %197 = arith.mulf %196, %196 : vector<1x32xf32>
      %cst_102 = arith.constant dense<0.000000e+00> : vector<1xf32>
      %198 = vector.multi_reduction <add>, %197, %cst_102 [1] : vector<1x32xf32> to vector<1xf32>
      %199 = vector.shape_cast %198 : vector<1xf32> to vector<1x1xf32>
      %cst_103 = arith.constant 3.200000e+01 : f32
      %200 = vector.broadcast %cst_103 : f32 to vector<1x1xf32>
      %201 = arith.divf %199, %200 : vector<1x1xf32>
      %202 = vector.broadcast %194 : vector<1x1xf32> to vector<1x32xf32>
      %203 = arith.subf %188, %202 : vector<1x32xf32>
      %cst_104 = arith.constant 9.99999974E-6 : f32
      %204 = vector.broadcast %cst_104 : f32 to vector<1x1xf32>
      %205 = arith.addf %201, %204 : vector<1x1xf32>
      %206 = math.rsqrt %205 : vector<1x1xf32>
      %207 = vector.broadcast %206 : vector<1x1xf32> to vector<1x32xf32>
      %208 = arith.mulf %203, %207 : vector<1x32xf32>
      %209 = arith.mulf %208, %189 : vector<1x32xf32>
      %210 = arith.addf %209, %190 : vector<1x32xf32>
      %211 = arith.truncf %210 : vector<1x32xf32> to vector<1x32xbf16>
      %c0_105 = arith.constant 0 : index
      %c0_106 = arith.constant 0 : index
      %212 = vector.load %arg20[%c0_105, %c0_106] : memref<32x128xbf16, #tpu.memory_space<vmem>>, vector<32x128xbf16>
      %cst_107 = arith.constant dense<0.000000e+00> : vector<1x128xf32>
      %213 = tpu.matmul %211, %212, %cst_107 {dimension_numbers = #tpu.dot_dimension_numbers<[1], [0], [0], [1], [0, 0, 1, 1], [], []>} : vector<1x32xbf16>, vector<32x128xbf16>, vector<1x128xf32> -> vector<1x128xf32>
      %c0_108 = arith.constant 0 : index
      %c0_109 = arith.constant 0 : index
      %c0_110 = arith.constant 0 : index
      %214 = vector.load %arg21[%c0_108, %c0_109, %c0_110] : memref<1x1x128xf32, #tpu.memory_space<vmem>>, vector<1x1x128xf32>
      %215 = vector.shape_cast %214 : vector<1x1x128xf32> to vector<1x128xf32>
      %216 = vector.shape_cast %213 : vector<1x128xf32> to vector<1x1x128xf32>
      tpu.vector_store %arg21[%c0_108, %c0_109, %c0_110], %216 {strides = array<i32>} : memref<1x1x128xf32, #tpu.memory_space<vmem>>, vector<1x1x128xf32>,
    } else {
    }
    return
  }
  func.func @transform_0(%arg0: i32, %arg1: i32) -> (i32, i32, i32) {
    %c0_i32 = arith.constant 0 : i32
    %c0_i32_0 = arith.constant 0 : i32
    %c0_i32_1 = arith.constant 0 : i32
    return %arg0, %c0_i32, %c0_i32_0 : i32, i32, i32
  }
  func.func @transform_1(%arg0: i32, %arg1: i32) -> (i32, i32) {
    %c0_i32 = arith.constant 0 : i32
    %c0_i32_0 = arith.constant 0 : i32
    %c0_i32_1 = arith.constant 0 : i32
    return %c0_i32, %c0_i32_0 : i32, i32
  }
  func.func @transform_2(%arg0: i32, %arg1: i32) -> (i32, i32) {
    %c0_i32 = arith.constant 0 : i32
    %c0_i32_0 = arith.constant 0 : i32
    %c0_i32_1 = arith.constant 0 : i32
    return %c0_i32, %c0_i32_0 : i32, i32
  }
  func.func @transform_3(%arg0: i32, %arg1: i32) -> (i32, i32) {
    %c0_i32 = arith.constant 0 : i32
    %c0_i32_0 = arith.constant 0 : i32
    %c0_i32_1 = arith.constant 0 : i32
    return %c0_i32, %c0_i32_0 : i32, i32
  }
  func.func @transform_4(%arg0: i32, %arg1: i32) -> (i32, i32, i32) {
    %c0_i32 = arith.constant 0 : i32
    %c0_i32_0 = arith.constant 0 : i32
    %c0_i32_1 = arith.constant 0 : i32
    return %arg1, %c0_i32, %c0_i32_0 : i32, i32, i32
  }
  func.func @transform_5(%arg0: i32, %arg1: i32) -> (i32, i32, i32) {
    %c0_i32 = arith.constant 0 : i32
    %c0_i32_0 = arith.constant 0 : i32
    %c0_i32_1 = arith.constant 0 : i32
    return %arg1, %c0_i32, %c0_i32_0 : i32, i32, i32
  }
  func.func @transform_6(%arg0: i32, %arg1: i32) -> (i32, i32, i32, i32) {
    %c0_i32 = arith.constant 0 : i32
    %c0_i32_0 = arith.constant 0 : i32
    %c0_i32_1 = arith.constant 0 : i32
    %c0_i32_2 = arith.constant 0 : i32
    return %arg1, %c0_i32, %c0_i32_0, %c0_i32_1 : i32, i32, i32, i32
  }
  func.func @transform_7(%arg0: i32, %arg1: i32) -> (i32, i32, i32, i32) {
    %c0_i32 = arith.constant 0 : i32
    %c0_i32_0 = arith.constant 0 : i32
    %c0_i32_1 = arith.constant 0 : i32
    %c0_i32_2 = arith.constant 0 : i32
    return %arg1, %c0_i32, %c0_i32_0, %c0_i32_1 : i32, i32, i32, i32
  }
  func.func @transform_8(%arg0: i32, %arg1: i32) -> (i32, i32, i32) {
    %c0_i32 = arith.constant 0 : i32
    %c0_i32_0 = arith.constant 0 : i32
    %c0_i32_1 = arith.constant 0 : i32
    return %arg1, %c0_i32, %c0_i32_0 : i32, i32, i32
  }
  func.func @transform_9(%arg0: i32, %arg1: i32) -> (i32, i32, i32) {
    %c0_i32 = arith.constant 0 : i32
    %c0_i32_0 = arith.constant 0 : i32
    %c0_i32_1 = arith.constant 0 : i32
    return %arg1, %c0_i32, %c0_i32_0 : i32, i32, i32
  }
  func.func @transform_10(%arg0: i32, %arg1: i32) -> (i32, i32, i32) {
    %c0_i32 = arith.constant 0 : i32
    %c0_i32_0 = arith.constant 0 : i32
    %c0_i32_1 = arith.constant 0 : i32
    return %arg1, %c0_i32, %c0_i32_0 : i32, i32, i32
  }
  func.func @transform_11(%arg0: i32, %arg1: i32) -> (i32, i32, i32) {
    %c0_i32 = arith.constant 0 : i32
    %c0_i32_0 = arith.constant 0 : i32
    %c0_i32_1 = arith.constant 0 : i32
    return %arg1, %c0_i32, %c0_i32_0 : i32, i32, i32
  }
  func.func @transform_12(%arg0: i32, %arg1: i32) -> (i32, i32, i32) {
    %c0_i32 = arith.constant 0 : i32
    %c0_i32_0 = arith.constant 0 : i32
    %c0_i32_1 = arith.constant 0 : i32
    return %arg1, %c0_i32, %c0_i32_0 : i32, i32, i32
  }
  func.func @transform_13(%arg0: i32, %arg1: i32) -> (i32, i32, i32) {
    %c0_i32 = arith.constant 0 : i32
    %c0_i32_0 = arith.constant 0 : i32
    %c0_i32_1 = arith.constant 0 : i32
    return %arg1, %c0_i32, %c0_i32_0 : i32, i32, i32
  }
  func.func @transform_14(%arg0: i32, %arg1: i32) -> (i32, i32, i32) {
    %c0_i32 = arith.constant 0 : i32
    %c0_i32_0 = arith.constant 0 : i32
    %c0_i32_1 = arith.constant 0 : i32
    return %arg1, %c0_i32, %c0_i32_0 : i32, i32, i32
  }
  func.func @transform_15(%arg0: i32, %arg1: i32) -> (i32, i32, i32) {
    %c0_i32 = arith.constant 0 : i32
    %c0_i32_0 = arith.constant 0 : i32
    %c0_i32_1 = arith.constant 0 : i32
    return %arg1, %c0_i32, %c0_i32_0 : i32, i32, i32
  }
  func.func @transform_16(%arg0: i32, %arg1: i32) -> (i32, i32) {
    %c0_i32 = arith.constant 0 : i32
    %c0_i32_0 = arith.constant 0 : i32
    %c0_i32_1 = arith.constant 0 : i32
    return %c0_i32, %c0_i32_0 : i32, i32
  }
  func.func @transform_17(%arg0: i32, %arg1: i32) -> (i32, i32) {
    %c0_i32 = arith.constant 0 : i32
    %c0_i32_0 = arith.constant 0 : i32
    %c0_i32_1 = arith.constant 0 : i32
    return %c0_i32, %c0_i32_0 : i32, i32
  }
  func.func @transform_18(%arg0: i32, %arg1: i32) -> (i32, i32) {
    %c0_i32 = arith.constant 0 : i32
    %c0_i32_0 = arith.constant 0 : i32
    %c0_i32_1 = arith.constant 0 : i32
    return %c0_i32, %c0_i32_0 : i32, i32
  }
  func.func @transform_19(%arg0: i32, %arg1: i32) -> (i32, i32, i32) {
    %c0_i32 = arith.constant 0 : i32
    %c0_i32_0 = arith.constant 0 : i32
    %c0_i32_1 = arith.constant 0 : i32
    return %arg0, %c0_i32, %c0_i32_0 : i32, i32, i32
  }
}

</mosaic_0001>

<bundles_post_ra>
// kernel: tpu_custom_call.1
= control target key start
LH: loop header
LB: loop body
LE: loop exit
PB: predicated region body
PF: predicated region fallthrough
CT: control target
= control target key end

     0   :  { %s3079_s0 = inlined_call_operand.vmem [shape: f32[2,8,1], index: 0, kind: input, shape index: {}]   ;;  %s3080_s1 = inlined_call_operand.vmem [shape: f32[1,32], index: 1, kind: input, shape index: {}]   ;;  %s3081_s2 = inlined_call_operand.hbm [shape: f32[1,32], index: 2, kind: input, shape index: {}]   ;;  %s3082_s3 = inlined_call_operand.hbm [shape: f32[8,32], index: 3, kind: input, shape index: {}]   ;;  %s3083_s4 = inlined_call_operand.hbm [shape: f32[2,1,32], index: 4, kind: input, shape index: {}]   ;;  %s3084_s5 = inlined_call_operand.hbm [shape: f32[2,1,32], index: 5, kind: input, shape index: {}]   ;;  %s3085_s6 = inlined_call_operand.vmem [shape: bf16[2,3,32,32], index: 6, kind: input, shape index: {}]   ;;  %s3086_s7 = inlined_call_operand.vmem [shape: f32[2,3,1,32], index: 7, kind: input, shape index: {}]   ;;  %s3087_s8 = inlined_call_operand.vmem [shape: bf16[2,32,32], index: 8, kind: input, shape index: {}]   ;;  %s3088_s9 = inlined_call_operand.vmem [shape: f32[2,1,32], index: 9, kind: input, shape index: {}]   ;;  %s3089_s10 = inlined_call_operand.vmem [shape: f32[2,1,32], index: 10, kind: input, shape index: {}]   ;;  %s3090_s11 = inlined_call_operand.hbm [shape: f32[2,1,32], index: 11, kind: input, shape index: {}]   ;;  %s3091_s12 = inlined_call_operand.vmem [shape: bf16[2,32,128], index: 12, kind: input, shape index: {}]   ;;  %s3092_s13 = inlined_call_operand.vmem [shape: f32[2,1,128], index: 13, kind: input, shape index: {}]   ;;  %s3093_s14 = inlined_call_operand.vmem [shape: bf16[2,128,32], index: 14, kind: input, shape index: {}]   ;;  %s3094_s15 = inlined_call_operand.vmem [shape: f32[2,1,32], index: 15, kind: input, shape index: {}]   ;;  %s3095_s16 = inlined_call_operand.vmem [shape: f32[1,32], index: 16, kind: input, shape index: {}]   ;;  %s3096_s17 = inlined_call_operand.hbm [shape: f32[1,32], index: 17, kind: input, shape index: {}]   ;;  %s3097_s18 = inlined_call_operand.vmem [shape: bf16[32,128], index: 18, kind: input, shape index: {}]   ;;  %s3098_s19 = inlined_call_operand.hbm [shape: f32[2,1,128], index: 19, kind: output, shape index: {}]  }
   0x1   :  { %3114 = sst [smem:[#allocation32_spill]] %s3079_s0 }
   0x2   :  { %3115 = sst [smem:[#allocation33_spill]] %s3080_s1 }
   0x3   :  { %3116 = sst [smem:[#allocation34_spill]] %s3081_s2 }
   0x4   :  { %3117 = sst [smem:[#allocation35_spill]] %s3082_s3 }
   0x5   :  { %3118 = sst [smem:[#allocation36_spill]] %s3083_s4 }
   0x6   :  { %3119 = sst [smem:[#allocation37_spill]] %s3084_s5 }
   0x7   :  { %3120 = sst [smem:[#allocation38_spill]] %s3085_s6 }
   0x8   :  { %3121 = sst [smem:[#allocation39_spill]] %s3086_s7 }
   0x9   :  { %3122 = sst [smem:[#allocation40_spill]] %s3087_s8 }
   0xa   :  { %3123 = sst [smem:[#allocation41_spill]] %s3088_s9 }
   0xb   :  { %3124 = sst [smem:[#allocation42_spill]] %s3089_s10 }
   0xc   :  { %3125 = sst [smem:[#allocation43_spill]] %s3090_s11 }
   0xd   :  { %3126 = sst [smem:[#allocation44_spill]] %s3091_s12 }
   0xe   :  { %3127 = sst [smem:[#allocation45_spill]] %s3092_s13 }
   0xf   :  { %3128 = sst [smem:[#allocation46_spill]] %s3093_s14 }
  0x10   :  { %3129 = sst [smem:[#allocation47_spill]] %s3094_s15 }
  0x11   :  { %3130 = sst [smem:[#allocation48_spill]] %s3095_s16 }
  0x12   :  { %3131 = sst [smem:[#allocation49_spill]] %s3096_s17 }
  0x13   :  { %3132 = sst [smem:[#allocation50_spill]] %s3097_s18 }
  0x14   :  { %3133 = sst [smem:[#allocation51_spill]] %s3098_s19 }
  0x15   :  { %24 = vsyncpa [#allocation5], 0 }
  0x16   :  { %25 = vsyncpa [#allocation8], 0 }
  0x17   :  { %26 = vsyncpa [#allocation6], 0 }
  0x18   :  { %28 = vsyncpa [#allocation6 + $0x1], 0  ;;  %s2644_s0 = smov 0   ;;  %s2646_s30 = smov 0  }
  0x19   :  { %s2648_s20 = smov 0   ;;  %s2650_s21 = smov 0  }
  0x1a   :  { %s2652_s1 = smov 0   ;;  %s2654_s22 = smov 0  }
  0x1b   :  { %s2656_s2 = smov 0   ;;  %s2658_s23 = smov 0  }
  0x1c   :  { %s2660_s24 = smov 0   ;;  %s2662_s25 = smov 0  }
  0x1d   :  { %s2664_s3 = smov 0  }
  0x1e LB: > { %3134 = sst [smem:[#allocation19_spill]] %s2491_s0  ;;  %s2698_s26 = sadd.s32 4294967295, %s2531_s3   ;;  %s2531_s3 = sphi %s2664_s3, %s34_s3   ;;  %s2527_s25 = sphi %s2662_s25, %s3196_s25   ;;  %s2523_s24 = sphi %s2660_s24, %s3195_s24   ;;  %s2519_s23 = sphi %s2658_s23, %s3194_s23   ;;  %s2515_s2 = sphi %s2656_s2, %s3193_s2   ;;  %s2511_s22 = sphi %s2654_s22, %s3192_s22   ;;  %s2507_s1 = sphi %s2652_s1, %s3191_s1   ;;  %s2503_s21 = sphi %s2650_s21, %s3190_s21   ;;  %s2499_s20 = sphi %s2648_s20, %s3189_s20   ;;  %s2495_s30 = sphi %s2646_s30, %s3198_s30   ;;  %s2491_s0 = sphi %s2644_s0, %s3197_s0  }
  0x1f   : > { %3135 = sst [smem:[#allocation20_spill]] %s2499_s20  ;;  %s1871_s27 = sadd.s32 4294967294, %s2531_s3  }
  0x20   : > { %3136 = sst [smem:[#allocation21_spill]] %s2507_s1  ;;  %p155_p0 = scmp.ne.s32.totalorder %s2507_s1, %s2503_s21 }
  0x21   : > { %3137 = sst [smem:[#allocation22_spill]] %s2511_s22  ;;  %p156_p1 = scmp.eq.s32.totalorder %s2698_s26, 0 }
  0x22   : > { %3138 = sst [smem:[#allocation23_spill]] %s2523_s24  ;;  %p527_p2 = scmp.ne.s32.totalorder %s2499_s20, %s2495_s30 }
  0x23   : > { %3139 = sst [smem:[#allocation24_spill]] %s2527_s25  ;;  %p2708_p3 = por %p156_p1, %p155_p0 }
  0x24   : > { %3140 = sst [smem:[#allocation25_spill]] %s2531_s3  ;;  %p528_p4 = scmp.eq.s32.totalorder %s2698_s26, 3 }
  0x25   : > { %p533_p5 = scmp.ne.s32.totalorder %s2495_s30, %s2491_s0  ;;  %p534_p6 = scmp.eq.s32.totalorder %s1871_s27, 3 }
  0x26   : > { %p2715_p7 = por %p528_p4, %p527_p2  ;;  %p1872_p8 = scmp.ge.s32.totalorder %s2531_s3, 1 }
  0x27   : > { %p2720_p9 = por %p534_p6, %p533_p5  ;;  %p541_p10 = scmp.lt.s32.totalorder %s2531_s3, 5 }
  0x28   : > { %s3142_s19 = scalar_select %p2715_p7, 1, 0 }
  0x29   : > { %s3144_s21 = scalar_select %p2720_p9, 1, 0 }
  0x2a   : > { %3143 = sst [smem:[#allocation26_spill]] %s3142_s19  ;;  %p2728_p11 = pnand %p1872_p8, %p541_p10 }
  0x2b   : > { %3145 = sst [smem:[#allocation27_spill]] %s3144_s21  ;;  %s2533_s19 = smov [#allocation4]  }
  0x2c   : > { %s3146_s18 = sld [smem:[#allocation34_spill]]  ;;  %p2043_p12 = pneg %p2728_p11 }
  0x2d   : > { %s558_s15 = sshll.u32 %s2533_s19, 4  ;;  %s43_s16 = sadd.s32 1, %s2523_s24  ;;  %s559_s15 = int_to_ptr.vmem [resolvable:$true] %s558_s15 }
  0x2e   : > { %p2736_p13 = pnand %p2043_p12, %p156_p1  ;;  %p44_p0 = scmp.ge.s32.totalorder %s43_s16, 2 }
  0x2f   : > { %s142_s28 = sadd.s32 1, %s2511_s22  ;;  %p149_p2 = scmp.ne.s32.totalorder %s2511_s22, %s2507_s1 }
  0x30   : > { %s3200_s16 = smov (%p44_p0, %s43_s16), 0  ;;  %p150_p4 = scmp.eq.s32.totalorder %s2531_s3, 0 }
  0x31   : > { %3149 = sst [smem:[#allocation28_spill]] %s3200_s16  ;;  %s139_s19 = ssub.s32 %s2523_s24, %s3200_s16 }
  0x32   : > { %s556_s0 = sshll.u32 %s3146_s18, 4  ;;  %s46_s18 = sadd.s32 1, %s2527_s25  ;;  %s557_s0 = int_to_ptr.hbm [resolvable:$true] %s556_s0 }
  0x33   : > { %2046 = dma.hbm_to_vmem [thread:$0]  (!%p2736_p13), %s557_s0, 16, %s559_s15, [#allocation5]  }
  0x34   : > { %s3202_s18 = smov (!%p44_p0, %s46_s18), %s2527_s25  ;;  %p140_p6 = scmp.eq.s32.totalorder %s139_s19, 0 }
  0x35   : > { %p48_p5 = scmp.ge.s32.totalorder %s3202_s18, 2  ;;  %p2753_p8 = por %p150_p4, %p149_p2 }
  0x36   : > { %p2070_p10 = scmp.lt.s32.totalorder %s2531_s3, 4  ;;  %s606_s13 = sand.u32 1, %s2531_s3  }
  0x37   : > { %s3204_s18 = smov (%p48_p5, %s3202_s18), 0  ;;  %s2767_s12 = sand.u32 1, %s2511_s22  }
  0x38   : > { %3151 = sst [smem:[#allocation29_spill]] %s3204_s18  ;;  %s514_s14 = ssub.s32 %s2527_s25, %s3204_s18 }
  0x39   : > { %s2761_s0 = scalar_select %p140_p6, %s2511_s22, %s142_s28  }
  0x3a   : > { %p515_p12 = scmp.eq.s32.totalorder %s514_s14, 0  ;;  %s3153_s4 = sld [smem:[#allocation36_spill]] }
  0x3b   : > { %3152 = sst [smem:[#allocation30_spill]] %s2761_s0  ;;  %s3154_s9 = sadd.s32 1, %s2499_s20 }
  0x3c   : > { %s2776_s7 = scalar_select %p515_p12, %s2499_s20, %s3154_s9  }
  0x3d   : > { %s609_s28 = scalar_lea.vmem [#allocation9], %s2767_s12  ;;  %p2783_p0 = pnand %p2070_p10, %p2753_p8 }
  0x3e   : > { %3155 = sst [smem:[#allocation31_spill]] %s2776_s7  ;;  %s616_s0 = sshll.u32 %s609_s28, 4  ;;  %s617_s0 = int_to_ptr.vmem [resolvable:$true] %s616_s0 }
  0x3f   : > { %s3157_s18 = sld [smem:[#allocation35_spill]]  ;;  %s607_s9 = scalar_lea.sflag [#allocation5], %s606_s13 }
  0x40   : > { %s612_s19 = scalar_lea.hbm %s3153_s4, %s2523_s24  ;;  %s3158_s5 = sld [smem:[#allocation37_spill]] }
  0x41   : > { %s614_s8 = sshll.u32 %s612_s19, 4  ;;  %s2534_s19 = smov [#allocation7]   ;;  %s615_s8 = int_to_ptr.hbm [resolvable:$true] %s614_s8 }
  0x42   : > { %2056 = dma.hbm_to_vmem [thread:$0]  (!%p2783_p0), %s615_s8, 16, %s617_s0, %s607_s9  }
  0x43   : > { %s570_s28 = sshll.u32 %s2534_s19, 4  ;;  %s626_s16 = scalar_lea.vmem [#allocation10], %s2767_s12  ;;  %s571_s28 = int_to_ptr.vmem [resolvable:$true] %s570_s28 }
  0x44   : > { %s633_s7 = sshll.u32 %s626_s16, 4  ;;  %s3159_s17 = sld [smem:[#allocation49_spill]]  ;;  %s634_s7 = int_to_ptr.vmem [resolvable:$true] %s633_s7 }
  0x45   : > { %s568_s4 = sshll.u32 %s3157_s18, 4  ;;  %s2535_s0 = smov [#allocation12]   ;;  %s569_s4 = int_to_ptr.hbm [resolvable:$true] %s568_s4 }
  0x46   : > { %s629_s22 = scalar_lea.hbm %s3158_s5, %s2523_s24  ;;  %s585_s19 = sshll.u32 %s2535_s0, 4  ;;  %s586_s19 = int_to_ptr.vmem [resolvable:$true] %s585_s19 }
  0x47   : > { %2049 = dma.hbm_to_vmem [thread:$0]  (!%p2736_p13), %s569_s4, 128, %s571_s28, [#allocation8]  }
  0x48   : > { %s631_s10 = sshll.u32 %s629_s22, 4  ;;  %s3160_s11 = sld [smem:[#allocation43_spill]]  ;;  %s632_s10 = int_to_ptr.hbm [resolvable:$true] %s631_s10 }
  0x49   : > { %2059 = dma.hbm_to_vmem [thread:$0]  (!%p2783_p0), %s632_s10, 16, %s634_s7, %s607_s9  }
  0x4a   : > { %s583_s18 = sshll.u32 %s3159_s17, 4  ;;  %s678_s28 = scalar_lea.vmem [#allocation11], %s2767_s12  ;;  %s584_s18 = int_to_ptr.hbm [resolvable:$true] %s583_s18 }
  0x4b   : > { %2052 = dma.hbm_to_vmem [thread:$0]  (!%p2736_p13), %s584_s18, 16, %s586_s19, [#allocation8]  }
  0x4c   : > { %s685_s15 = sshll.u32 %s678_s28, 4  ;;  %722 = sbr.rel (%p2728_p11) target bundleno = 2573 (0xa0d), region = 96  ;;  %s686_s15 = int_to_ptr.vmem [resolvable:$true] %s685_s15 }
  0x4e   : > { %s681_s22 = scalar_lea.hbm %s3160_s11, %s2523_s24 }
  0x4f   : > { %s683_s16 = sshll.u32 %s681_s22, 4  ;;  %s684_s16 = int_to_ptr.hbm [resolvable:$true] %s683_s16 }
  0x50   : > { %2062 = dma.hbm_to_vmem [thread:$0]  (!%p2783_p0), %s684_s16, 16, %s686_s15, %s607_s9  }
  0x51   : > { %2470 = dma.done.wait (%p156_p1), [#allocation5], 16  }
  0x52   : > { %2472 = vsyncadd (%p156_p1), [#allocation5], 4294967280 }
  0x53   : > { %2474 = dma.done.wait (%p156_p1), [#allocation8], 128  }
  0x54   : > { %2476 = vsyncadd (%p156_p1), [#allocation8], 4294967168  ;;  %s734_s7 = sand.u32 1, %s2698_s26   ;;  %s2825_s12 = sand.u32 1, %s2507_s1  }
  0x55   : > { %s735_s21 = scalar_lea.sflag [#allocation5], %s734_s7 }
  0x56   : > { %2478 = dma.done.wait (%p2708_p3), %s735_s21, 48  }
  0x57   : > { %2480 = vsyncadd (%p2708_p3), %s735_s21, 4294967248 }
  0x58   : > { %2482 = dma.done.wait (%p156_p1), [#allocation8], 16  }
  0x59   : > { %2484 = vsyncadd (%p156_p1), [#allocation8], 4294967280  ;;  %p862_p11 = scmp.lt.s32.totalorder %s2519_s23, 1  ;;  %p866_p13 = scmp.lt.s32.totalorder %s2515_s2, 1 }
  0x5a   : > { %s3161_s0 = sld [smem:[#allocation32_spill]]  ;;  %s3171_s17 = sand.u32 1, %s2495_s30  }
  0x5b   : > { %s863_s29 = scalar_select %p862_p11, %s2519_s23, 1 }
  0x5c   : > { %s2843_s8 = scalar_select %p866_p13, %s2515_s2, 1 }
  0x5d   : > { %s1881_s26 = sshll.u32 %s863_s29, 3  ;;  %s3162_s6 = sld [smem:[#allocation38_spill]] }
  0x5e   : > { %s2021_s25 = smul.u32 48, %s2843_s8  ;;  %s1998_s22 = sshll.u32 %s2843_s8, 4 }
  0x5f   : > { %s2022_s4 = smul.u32 3, %s2843_s8  ;;  %s3163_s9 = sld [smem:[#allocation40_spill]] }
  0x60   : > { %s865_s19 = scalar_lea.vmem %s3161_s0, %s1881_s26  ;;  %s3164_s29 = sld [smem:[#allocation39_spill]] }
  0x61   : > { %s3165_s18 = sld [smem:[#allocation41_spill]]  ;;  %s2000_s27 = sshll.u32 %s2843_s8, 6 }
  0x62   : > { %s3166_s24 = sld [smem:[#allocation42_spill]]  ;;  %p1889_p1 = scmp.ne.s32.totalorder %s2515_s2, 0 }
  0x63   : > { %s2854_s16 = scalar_lea.vmem %s3162_s6, %s2021_s25  ;;  %s3167_s6 = sld [smem:[#allocation44_spill]] }
  0x64   : > { %s3168_s21 = sld [smem:[#allocation45_spill]] }
  0x65   : > { %s2859_s14 = scalar_lea.vmem %s3163_s9, %s1998_s22  ;;  %s3172_s25 = sld [smem:[#allocation33_spill]] (!%p1889_p1) }
  0x66   : > { %s2864_s5 = scalar_lea.vmem %s3164_s29, %s2022_s4  ;;  %s3169_s29 = sld [smem:[#allocation46_spill]] }
  0x67   : > { %s882_s0 = scalar_lea.vmem %s3165_s18, %s2843_s8  ;;  %s3170_s18 = sld [smem:[#allocation47_spill]] }
  0x68   : > { %s885_s28 = scalar_lea.vmem %s3166_s24, %s2843_s8  ;;  %s2895_s24 = scalar_lea.vmem [#allocation13], %s3171_s17 }
  0x69   : > { %s2877_s1 = scalar_lea.vmem %s3167_s6, %s1998_s22  ;;  %906 = sbr.rel (%p1889_p1) target bundleno = 234 (0xea), region = 124 }
  0x6a   : > { %s893_s20 = scalar_lea.vmem %s3168_s21, %s2843_s8 }
  0x6c   : > { %s2887_s3 = scalar_lea.vmem %s3169_s29, %s2000_s27 }
  0x6d   : > { %s901_s11 = scalar_lea.vmem %s3170_s18, %s2843_s8 }
  0x6e   : > { %v907_v0 = vld [vmem:[%s865_s19] sm:$0xff]  ;;  %v2536_v1 = vmov 0   ;;  %v2176_v3 = vld [vmem:[#allocation4] ss:$0 sm:$0xff]  ;;  %v923_v6 = vld [vmem:[#allocation7] sm:$0xff]  ;;  %vm925_vm0 = vcmask 261120  }
  0x6f   : > { %2174 = vset.pattern.permute.xlu0 %v2536_v1  ;;  %v2175_v2 = vld [vmem:[%s3172_s25] ss:$0 sm:$0xff] }
  0x70   : > { %911 = vperm.xlu0 %2174, %v907_v0  }
  0xe2   : > { %v912_v4 = vpop.permute.xlu0 %911 }
  0xe3   : > { %v917_v5 = vmul.f32 %v2175_v2, %v912_v4 }
  0xe5   : > { %v922_v7 = vadd.f32 %v2176_v3, %v917_v5 }
  0xe7   : > { %v924_v8 = vadd.f32 %v923_v6, %v922_v7 }
  0xe9   : > { %926 = vst.msk [vmem:[#allocation2] sm:$0xff] %vm925_vm0, %v924_v8 }
  0xea PF: > { %vm930_vm1 = vcmask 261120   ;;  %v2537_v11 = vmov 32.0   ;;  %v2002_v23 = vld [vmem:[%s2854_s16 + $0x8] sm:$0xff]  ;;  %v2004_v24 = vld [vmem:[%s2854_s16 + $0x18] sm:$0xff]  ;;  %v2001_v25 = vld [vmem:[%s2854_s16] sm:$0xff]  ;;  %s3173_s19 = scalar_lea.vmem [#allocation9], %s2825_s12 }
  0xeb   : > { %2187 = vrcp.f32 %v2537_v11  ;;  %998 = vmatpush.bf16.msra.mxu0 %v2002_v23  ;;  %1034 = vmatpush.bf16.msra.mxu2 %v2004_v24  ;;  %v2003_v26 = vld [vmem:[%s2854_s16 + $0x10] sm:$0xff]  ;;  %v2006_v27 = vld [vmem:[%s2854_s16 + $0x28] sm:$0xff]  ;;  %v2005_v30 = vld [vmem:[%s2854_s16 + $0x20] sm:$0xff]  ;;  %s3174_s16 = scalar_lea.vmem [#allocation10], %s2825_s12  ;;  %vm1078_vm6 = vcmask 64512   ;;  %s2538_s15 = smov 112  }
  0xec   : > { %v2177_v38 = vld [vmem:[%s3173_s19] ss:$0 sm:$0xff]  ;;  %v2180_v49 = vld [vmem:[%s2864_s5 + $0x1] ss:$0 sm:$0xff]  ;;  %s2539_s9 = smov 120   ;;  %s2540_s7 = smov 104  }
  0xed   : > { %v2178_v41 = vld [vmem:[%s3174_s16] ss:$0 sm:$0xff]  ;;  %v2181_v60 = vld [vmem:[%s2864_s5 + $0x2] ss:$0 sm:$0xff]  ;;  %vm1113_vm7 = vcmask 1043456   ;;  %vm1131_vm8 = vcmask 60416  }
  0xee   : > { %v2179_v45 = vld [vmem:[%s2864_s5] ss:$0 sm:$0xff]  ;;  %s2541_s5 = smov 8   ;;  %s2542_s21 = smov 16   ;;  %vm1203_vm9 = vcmask 126016   ;;  %vm1266_vm10 = vcmask 191616  }
  0xef   : > { %999 = vmatpush.bf16.msra.mxu0 %v2001_v25  ;;  %1035 = vmatpush.bf16.msra.mxu2 %v2003_v26  ;;  %s2543_s27 = smov 24   ;;  %vm1329_vm11 = vcmask 257216   ;;  %s3177_s13 = scalar_lea.vmem [#allocation11], %s2825_s12 }
  0xf0   : > { %v2901_v9 = vld [vmem:[#allocation2] sm:$0xff]  ;;  %p1986_p3 = scmp.ne.s32.totalorder %s2515_s2, 1 }
  0xf1   : > { %v931_v10 = vsel %vm930_vm1, %v2901_v9, 0.0  ;;  %v2188_v12 = vpop.eup %2187  ;;  %s3180_s17 = sld [smem:[#allocation50_spill]] (!%p1986_p3) }
  0xf2   : > { %932 = vadd.xlane.f32.xlu0 %v931_v10  ;;  %v935_v13 = vmul.f32 32.0, %v2188_v12  ;;  %vm939_vm2 = vweird.f32 %v2188_v12  ;;  %s3181_s19 = sld [smem:[#allocation48_spill]] (!%p1986_p3) }
  0xf3   : > { %1070 = vmatpush.bf16.msrb.mxu2 %v2006_v27 }
  0xf4   : > { %v936_v14 = vsub.f32 1.0, %v935_v13 }
  0xf6   : > { %v937_v15 = vmul.f32 %v2188_v12, %v936_v14 }
  0xf7   : > { %1071 = vmatpush.bf16.msrb.mxu2 %v2005_v30 }
  0xf8   : > { %v938_v16 = vadd.f32 %v2188_v12, %v937_v15 }
  0xfa   : > { %v2905_v17 = vsel %vm939_vm2, %v2188_v12, %v938_v16 }
 0x165   : > { %v933_v18 = vpop.xlane.xlu0 %932 }
 0x166   : > { %v941_v19 = vmul.f32 %v2905_v17, %v933_v18 }
 0x168   : > { %v942_v20 = vsub.f32 %v2901_v9, %v941_v19 }
 0x16a   : > { %v943_v21 = vmul.f32 %v942_v20, %v942_v20 }
 0x16c   : > { %v944_v22 = vsel %vm930_vm1, %v943_v21, 0.0 }
 0x16d   : > { %945 = vadd.xlane.f32.xlu0 %v944_v22 }
 0x1e0   : > { %v946_v28 = vpop.xlane.xlu0 %945 }
 0x1e1   : > { %v947_v29 = vmul.f32 %v946_v28, %v2905_v17 }
 0x1e3   : > { %v948_v31 = vadd.f32 1e-05, %v947_v29 }
 0x1e5   : > { %2189 = vrsqrt.f32 %v948_v31  ;;  %vm955_vm4 = vweird.f32 %v948_v31 }
 0x1eb   : > { %v2190_v32 = vpop.eup %2189 }
 0x1ec   : > { %v950_v33 = vmul.f32 %v2190_v32, %v948_v31  ;;  %vm956_vm3 = vweird.f32 %v2190_v32 }
 0x1ed   : > { %vm957_vm5 = vmor %vm955_vm4, %vm956_vm3 }
 0x1ee   : > { %v951_v34 = vmul.f32 %v2190_v32, %v950_v33 }
 0x1f0   : > { %v952_v35 = vmul.f32 0.5, %v951_v34 }
 0x1f2   : > { %v953_v36 = vsub.f32 1.5, %v952_v35 }
 0x1f4   : > { %v954_v37 = vmul.f32 %v2190_v32, %v953_v36 }
 0x1f6   : > { %v958_v39 = vsel %vm957_vm5, %v2190_v32, %v954_v37 }
 0x1f7   : > { %v959_v40 = vmul.f32 %v958_v39, %v942_v20 }
 0x1f9   : > { %v963_v42 = vmul.f32 %v2177_v38, %v959_v40 }
 0x1fb   : > { %v967_v43 = vadd.f32 %v2178_v41, %v963_v42 }
 0x1fd   : > { %v968_v44 = vpack.c.bf16 %v967_v43, %v967_v43 }
 0x1ff   : > { %1898 = vmatmul.msk.bf16.vlgmr.msra.gmra.mxu0 %vm930_vm1, %v968_v44  ;;  %1912 = vmatmul.msk.bf16.vlgmr.msra.gmra.mxu2 %vm930_vm1, %v968_v44 }
 0x20f   : > { %1926 = vmatmul.msk.bf16.vlgmr.msrb.gmra.mxu2 %vm930_vm1, %v968_v44 }
 0x27c   : > { %v1001_v46 = vpop.f32.mrf.mxu0 }
 0x27d   : > { %v1002_v47 = vadd.f32 %v2179_v45, %v1001_v46 }
 0x27f   : > { %v1005_v48 = vpack.c.bf16 %v1002_v47, %v1002_v47 }
 0x281   : > { %v1134_v50 = vunpack.c.l.b16 %v1005_v48 }
 0x282   : > { %v1037_v51 = vpop.f32.mrf.mxu2 }
 0x283   : > { %v1135_v52 = vpack.c.b16 %v1134_v50, %v1134_v50  ;;  %v1038_v53 = vadd.f32 %v2180_v49, %v1037_v51 }
 0x284   : > { %v1003_v54 = vpop.f32.mrf.mxu0 }
 0x285   : > { %v1041_v55 = vpack.c.bf16 %v1038_v53, %v1038_v53  ;;  %1205 = vrot.lane.b32.xlu0 %v1135_v52, %s2538_s15 }
 0x287   : > { %v1139_v56 = vunpack.c.l.b16 %v1041_v55  ;;  %v1083_v57 = vsel %vm1078_vm6, %v1041_v55, 0 }
 0x288   : > { %1092 = vmatpush.bf16.xpose.msra.mxu3 %v1083_v57 }
 0x289   : > { %v1140_v58 = vpack.c.b16 %v1139_v56, %v1139_v56 }
 0x28a   : > { %v1039_v59 = vpop.f32.mrf.mxu2 }
 0x28b   : > { %1207 = vrot.lane.b32.xlu2 %v1140_v58, %s2538_s15  ;;  %1141 = vrot.lane.b32.xlu1 %v1140_v58, %s2539_s9 }
 0x28f   : > { %1927 = vmatmul.msk.bf16.vlgmr.msra.gmra.mxu3 %vm1078_vm6, %v1005_v48 }
 0x292   : > { %v1073_v61 = vpop.f32.mrf.mxu2 }
 0x293   : > { %v1074_v62 = vadd.f32 %v2181_v60, %v1073_v61  ;;  %1270 = vrot.lane.b32.xlu2 %v1140_v58, %s2540_s7  ;;  %1136 = vrot.lane.b32.xlu1 %v1135_v52, %s2539_s9 }
 0x295   : > { %v2934_v63 = vpack.c.bf16 %v1074_v62, %v1074_v62 }
 0x297   : > { %v1115_v0 = vsel %vm1113_vm7, %v2934_v63, 0  ;;  %v1175_v49 = vunpack.c.l.b16 %v2934_v63 }
 0x298   : > { %1124 = vmatpush.bf16.msrb.mxu0 %v1115_v0 }
 0x299   : > { %v1176_v50 = vpack.c.b16 %v1175_v49, %v1175_v49  ;;  %v2184_v49 = vld [vmem:[%s3177_s13] ss:$0 sm:$0xff] }
 0x29a   : > { %v1075_v1 = vpop.f32.mrf.mxu2 }
 0x29b   : > { %1268 = vrot.lane.b32.xlu1 %v1135_v52, %s2540_s7 }
 0x2e5   : > { %v1208_v2 = vpop.permute.xlu2 %1207 }
 0x2e6   : > { %v1213_v3 = vsel %vm1078_vm6, %v1208_v2, 0 }
 0x2e7   : > { %1222 = vmatpush.bf16.xpose.msrb.mxu3 %v1213_v3 }
 0x2ed   : > { %v1271_v5 = vpop.permute.xlu2 %1270 }
 0x2ee   : > { %v1276_v8 = vsel %vm1078_vm6, %v1271_v5, 0 }
 0x2f7   : > { %v1206_v4 = vpop.permute.xlu0 %1205 }
 0x2f8   : > { %1931 = vmatmul.msk.bf16.vlgmr.msrb.gmra.mxu3 %vm1078_vm6, %v1206_v4 }
 0x2fd   : > { %v1142_v6 = vpop.permute.xlu1 %1141 }
 0x2fe   : > { %v1147_v7 = vsel %vm1078_vm6, %v1142_v6, 0 }
 0x2ff   : > { %1156 = vmatpush.bf16.xpose.msra.mxu1 %v1147_v7 }
 0x305   : > { %v1137_v10 = vpop.permute.xlu1 %1136 }
 0x306   : > { %1929 = vmatmul.msk.bf16.vlgmr.msra.gmra.mxu1 %vm1078_vm6, %v1137_v10 }
 0x307   : > { %1285 = vmatpush.bf16.xpose.msrb.mxu1 %v1276_v8 }
 0x30d   : > { %v1269_v13 = vpop.permute.xlu1 %1268 }
 0x312   : > { %v1094_v11 = vpop.f32.mrf.mxu3 }
 0x313   : > { %v1098_v12 = vsel %vm1078_vm6, %v1094_v11, -inf }
 0x314   : > { %1099 = vmax.xlane.f32.xlu1 %v1098_v12 }
 0x316   : > { %1933 = vmatmul.msk.bf16.vlgmr.msrb.gmra.mxu1 %vm1078_vm6, %v1269_v13 }
 0x31a   : > { %v1096_v14 = vpop.f32.mrf.mxu3 }
 0x37b   : > { %v1224_v15 = vpop.f32.mrf.mxu3 }
 0x37c   : > { %v1228_v24 = vsel %vm1078_vm6, %v1224_v15, -inf }
 0x383   : > { %v1158_v16 = vpop.f32.mrf.mxu1  ;;  %v1226_v18 = vpop.f32.mrf.mxu3 }
 0x384   : > { %v1162_v19 = vsel %vm1078_vm6, %v1158_v16, -inf }
 0x385   : > { %1163 = vmax.xlane.f32.xlu2 %v1162_v19 }
 0x387   : > { %v1100_v20 = vpop.xlane.xlu1 %1099 }
 0x388   : > { %v1101_v21 = vsub.f32 %v1094_v11, %v1100_v20 }
 0x38a   : > { %v1102_v22 = vmul.f32 1.442695, %v1101_v21  ;;  %v2008_v21 = vld [vmem:[%s2859_s14 + $0x8] sm:$0xff] }
 0x38b   : > { %v1160_v23 = vpop.f32.mrf.mxu1  ;;  %1361 = vmatpush.bf16.msra.mxu3 %v2008_v21 }
 0x38c   : > { %2191 = vpow2.f32 %v1102_v22  ;;  %v2007_v22 = vld [vmem:[%s2859_s14] sm:$0xff] }
 0x38d   : > { %1229 = vmax.xlane.f32.xlu2 %v1228_v24 }
 0x38f   : > { %1362 = vmatpush.bf16.msra.mxu3 %v2007_v22 }
 0x392   : > { %v2192_v25 = vpop.eup %2191 }
 0x393   : > { %v1287_v26 = vpop.f32.mrf.mxu1  ;;  %v1104_v27 = vsel %vm1078_vm6, %v2192_v25, 0.0 }
 0x394   : > { %1105 = vadd.xlane.f32.xlu1 %v1104_v27  ;;  %v1291_v28 = vsel %vm1078_vm6, %v1287_v26, -inf }
 0x395   : > { %1292 = vmax.xlane.f32.xlu0 %v1291_v28 }
 0x39b   : > { %v1289_v29 = vpop.f32.mrf.mxu1 }
 0x3f8   : > { %v1164_v30 = vpop.xlane.xlu2 %1163 }
 0x3f9   : > { %v1165_v31 = vsub.f32 %v1158_v16, %v1164_v30 }
 0x3fb   : > { %v1166_v32 = vmul.f32 1.442695, %v1165_v31 }
 0x3fd   : > { %2193 = vpow2.f32 %v1166_v32 }
 0x400   : > { %v1230_v33 = vpop.xlane.xlu2 %1229 }
 0x401   : > { %v1231_v34 = vsub.f32 %v1224_v15, %v1230_v33 }
 0x403   : > { %v2194_v35 = vpop.eup %2193  ;;  %v1232_v36 = vmul.f32 1.442695, %v1231_v34 }
 0x404   : > { %v1168_v37 = vsel %vm1078_vm6, %v2194_v35, 0.0 }
 0x405   : > { %2195 = vpow2.f32 %v1232_v36  ;;  %1169 = vadd.xlane.f32.xlu2 %v1168_v37  ;;  %v2010_v36 = vld [vmem:[%s2877_s1 + $0x8] sm:$0xff]  ;;  %v2009_v37 = vld [vmem:[%s2877_s1] sm:$0xff] }
 0x407   : > { %v1106_v38 = vpop.xlane.xlu1 %1105 }
 0x408   : > { %2197 = vrcp.f32 %v1106_v38  ;;  %v1293_v39 = vpop.xlane.xlu0 %1292 }
 0x409   : > { %v1294_v40 = vsub.f32 %v1287_v26, %v1293_v39 }
 0x40b   : > { %v2196_v41 = vpop.eup %2195  ;;  %v1295_v42 = vmul.f32 1.442695, %v1294_v40 }
 0x40c   : > { %v1234_v43 = vsel %vm1078_vm6, %v2196_v41, 0.0 }
 0x40d   : > { %2199 = vpow2.f32 %v1295_v42  ;;  %1235 = vadd.xlane.f32.xlu0 %v1234_v43 }
 0x40e   : > { %v2198_v44 = vpop.eup %2197 }
 0x40f   : > { %v1108_v45 = vmul.f32 %v2198_v44, %v2192_v25  ;;  %v2182_v25 = vld [vmem:[%s882_s0] ss:$0 sm:$0xff] }
 0x411   : > { %v1109_v46 = vpack.c.bf16 %v1108_v45, %v1108_v45 }
 0x413   : > { %v2200_v47 = vpop.eup %2199  ;;  %1928 = vmatmul.msk.bf16.vlgmr.msrb.gmra.mxu0 %vm1078_vm6, %v1109_v46  ;;  %v2183_v46 = vld [vmem:[%s885_s28] ss:$0 sm:$0xff] }
 0x414   : > { %v1297_v48 = vsel %vm1078_vm6, %v2200_v47, 0.0 }
 0x415   : > { %1298 = vadd.xlane.f32.xlu1 %v1297_v48 }
 0x41d   : > { %1177 = vrot.lane.b32.xlu2 %v1176_v50, %s2539_s9 }
 0x421   : > { %1240 = vrot.lane.b32.xlu0 %v1176_v50, %s2538_s15 }
 0x42e   : > { %1303 = vrot.lane.b32.xlu1 %v1176_v50, %s2540_s7 }
 0x478   : > { %v1170_v51 = vpop.xlane.xlu2 %1169 }
 0x479   : > { %2201 = vrcp.f32 %v1170_v51 }
 0x47f   : > { %v2202_v52 = vpop.eup %2201 }
 0x480   : > { %v1172_v53 = vmul.f32 %v2202_v52, %v2194_v35  ;;  %v1178_v54 = vpop.permute.xlu2 %1177  ;;  %v1236_v57 = vpop.xlane.xlu0 %1235 }
 0x481   : > { %v1183_v55 = vsel %vm1113_vm7, %v1178_v54, 0  ;;  %2203 = vrcp.f32 %v1236_v57  ;;  %v2017_v54 = vld [vmem:[%s2887_s3 + $0x30] sm:$0xff]  ;;  %v2014_v57 = vld [vmem:[%s2887_s3 + $0x18] sm:$0xff] }
 0x482   : > { %v1173_v56 = vpack.c.bf16 %v1172_v53, %v1172_v53  ;;  %1192 = vmatpush.bf16.msra.mxu2 %v1183_v55  ;;  %v2018_v53 = vld [vmem:[%s2887_s3 + $0x38] sm:$0xff]  ;;  %v2016_v55 = vld [vmem:[%s2887_s3 + $0x28] sm:$0xff] }
 0x483   : > { %1526 = vmatpush.bf16.msra.mxu1 %v2018_v53 }
 0x485   : > { %1930 = vmatmul.msk.bf16.vlgmr.msra.gmra.mxu2 %vm1078_vm6, %v1173_v56  ;;  %v2015_v56 = vld [vmem:[%s2887_s3 + $0x20] sm:$0xff] }
 0x487   : > { %v2204_v58 = vpop.eup %2203  ;;  %1527 = vmatpush.bf16.msra.mxu1 %v2017_v54 }
 0x488   : > { %v1238_v61 = vmul.f32 %v2204_v58, %v2196_v41  ;;  %v1299_v62 = vpop.xlane.xlu1 %1298  ;;  %v2013_v58 = vld [vmem:[%s2887_s3 + $0x10] sm:$0xff] }
 0x489   : > { %2205 = vrcp.f32 %v1299_v62 }
 0x48a   : > { %v1239_v1 = vpack.c.bf16 %v1238_v61, %v1238_v61  ;;  %v2185_v61 = vld [vmem:[%s893_s20] ss:$0 sm:$0xff] }
 0x48b   : > { %1528 = vmatpush.bf16.msra.mxu1 %v2016_v55 }
 0x48f   : > { %v2206_v3 = vpop.eup %2205  ;;  %1529 = vmatpush.bf16.msra.mxu1 %v2015_v56 }
 0x490   : > { %v1126_v59 = vpop.f32.mrf.mxu0  ;;  %v1301_v4 = vmul.f32 %v2206_v3, %v2200_v47 }
 0x491   : > { %v1130_v60 = vpack.c.bf16 %v1126_v59, %v1126_v59  ;;  %v2012_v59 = vld [vmem:[%s2887_s3 + $0x8] sm:$0xff] }
 0x492   : > { %v1302_v7 = vpack.c.bf16 %v1301_v4, %v1301_v4 }
 0x493   : > { %1132 = vst.msk [vmem:[#allocation3] sm:$0xf] %vm1131_vm8, %v1130_v60  ;;  %v1241_v63 = vpop.permute.xlu0 %1240  ;;  %1530 = vmatpush.bf16.msra.mxu1 %v2014_v57  ;;  %v2011_v60 = vld [vmem:[%s2887_s3] sm:$0xff] }
 0x494   : > { %v1246_v0 = vsel %vm1113_vm7, %v1241_v63, 0 }
 0x495   : > { %1255 = vmatpush.bf16.msra.mxu0 %v1246_v0 }
 0x497   : > { %1531 = vmatpush.bf16.msra.mxu1 %v2013_v58 }
 0x498   : > { %v1128_v2 = vpop.f32.mrf.mxu0  ;;  %1932 = vmatmul.msk.bf16.vlgmr.msra.gmra.mxu0 %vm1078_vm6, %v1239_v1 }
 0x499   : > { %1431 = vmatpush.bf16.msrb.mxu0 %v2010_v36 }
 0x49b   : > { %1532 = vmatpush.bf16.msra.mxu1 %v2012_v59 }
 0x49d   : > { %1432 = vmatpush.bf16.msrb.mxu0 %v2009_v37 }
 0x49f   : > { %1533 = vmatpush.bf16.msra.mxu1 %v2011_v60 }
 0x4a0   : > { %v1304_v5 = vpop.permute.xlu1 %1303 }
 0x4a1   : > { %v1309_v6 = vsel %vm1113_vm7, %v1304_v5, 0 }
 0x4a2   : > { %1318 = vmatpush.bf16.msrb.mxu2 %v1309_v6 }
 0x4a5   : > { %1934 = vmatmul.msk.bf16.vlgmr.msrb.gmra.mxu2 %vm1078_vm6, %v1302_v7 }
 0x508   : > { %v1194_v8 = vpop.f32.mrf.mxu2 }
 0x509   : > { %v1198_v10 = vpack.c.bf16 %v1194_v8, %v1194_v8 }
 0x50b   : > { %1200 = vrot.lane.b32.xlu2 %v1198_v10, %s2541_s5 }
 0x510   : > { %v1196_v11 = vpop.f32.mrf.mxu2 }
 0x515   : > { %v1257_v12 = vpop.f32.mrf.mxu0 }
 0x516   : > { %v1261_v13 = vpack.c.bf16 %v1257_v12, %v1257_v12 }
 0x518   : > { %1263 = vrot.lane.b32.xlu2 %v1261_v13, %s2542_s21 }
 0x51d   : > { %v1259_v14 = vpop.f32.mrf.mxu0 }
 0x528   : > { %v1320_v15 = vpop.f32.mrf.mxu2 }
 0x529   : > { %v1324_v16 = vpack.c.bf16 %v1320_v15, %v1320_v15 }
 0x52b   : > { %1326 = vrot.lane.b32.xlu0 %v1324_v16, %s2543_s27  ;;  %v2186_v16 = vld [vmem:[%s901_s11] ss:$0 sm:$0xff] }
 0x530   : > { %v1322_v18 = vpop.f32.mrf.mxu2 }
 0x565   : > { %v1201_v19 = vpop.permute.xlu2 %1200 }
 0x566   : > { %1204 = vst.msk [vmem:[#allocation3] sm:$0xf] %vm1203_vm9, %v1201_v19 }
 0x572   : > { %v1264_v20 = vpop.permute.xlu2 %1263 }
 0x573   : > { %1267 = vst.msk [vmem:[#allocation3] sm:$0xf] %vm1266_vm10, %v1264_v20 }
 0x59d   : > { %v1327_v23 = vpop.permute.xlu0 %1326 }
 0x59e   : > { %1330 = vst.msk [vmem:[#allocation3] sm:$0xf] %vm1329_vm11, %v1327_v23 }
 0x5a5   : > { %v1331_v24 = vld [vmem:[#allocation3] sm:$0xf] }
 0x5a6   : > { %1943 = vmatmul.msk.bf16.vlgmr.msra.gmra.mxu3 %vm930_vm1, %v1331_v24 }
 0x629   : > { %v1364_v26 = vpop.f32.mrf.mxu3 }
 0x62a   : > { %v1365_v27 = vadd.f32 %v2182_v25, %v1364_v26 }
 0x62c   : > { %v2973_v28 = vadd.f32 %v1365_v27, %v2901_v9 }
 0x62e   : > { %v1371_v29 = vsel %vm930_vm1, %v2973_v28, 0.0 }
 0x62f   : > { %1372 = vadd.xlane.f32.xlu1 %v1371_v29 }
 0x631   : > { %v1366_v30 = vpop.f32.mrf.mxu3 }
 0x6a2   : > { %v1373_v31 = vpop.xlane.xlu1 %1372 }
 0x6a3   : > { %v1374_v32 = vmul.f32 %v1373_v31, %v2905_v17 }
 0x6a5   : > { %v1375_v33 = vsub.f32 %v2973_v28, %v1374_v32 }
 0x6a7   : > { %v1376_v34 = vmul.f32 %v1375_v33, %v1375_v33 }
 0x6a9   : > { %v1377_v35 = vsel %vm930_vm1, %v1376_v34, 0.0 }
 0x6aa   : > { %1378 = vadd.xlane.f32.xlu2 %v1377_v35 }
 0x71d   : > { %v1379_v9 = vpop.xlane.xlu2 %1378 }
 0x71e   : > { %v1380_v38 = vmul.f32 %v1379_v9, %v2905_v17 }
 0x720   : > { %v1381_v39 = vadd.f32 1e-05, %v1380_v38 }
 0x722   : > { %2207 = vrsqrt.f32 %v1381_v39  ;;  %vm1388_vm13 = vweird.f32 %v1381_v39 }
 0x728   : > { %v2208_v40 = vpop.eup %2207 }
 0x729   : > { %v1383_v41 = vmul.f32 %v2208_v40, %v1381_v39  ;;  %vm1389_vm12 = vweird.f32 %v2208_v40 }
 0x72a   : > { %vm1390_vm14 = vmor %vm1388_vm13, %vm1389_vm12 }
 0x72b   : > { %v1384_v42 = vmul.f32 %v2208_v40, %v1383_v41 }
 0x72d   : > { %v1385_v43 = vmul.f32 0.5, %v1384_v42 }
 0x72f   : > { %v1386_v44 = vsub.f32 1.5, %v1385_v43 }
 0x731   : > { %v1387_v45 = vmul.f32 %v2208_v40, %v1386_v44 }
 0x733   : > { %v1391_v47 = vsel %vm1390_vm14, %v2208_v40, %v1387_v45 }
 0x734   : > { %v1392_v48 = vmul.f32 %v1391_v47, %v1375_v33 }
 0x736   : > { %v1396_v50 = vmul.f32 %v2183_v46, %v1392_v48 }
 0x738   : > { %v1400_v51 = vadd.f32 %v2184_v49, %v1396_v50 }
 0x73a   : > { %v1401_v52 = vpack.c.bf16 %v1400_v51, %v1400_v51 }
 0x73c   : > { %1952 = vmatmul.msk.bf16.vlgmr.msrb.gmra.mxu0 %vm930_vm1, %v1401_v52 }
 0x7b9   : > { %v1434_v62 = vpop.f32.mrf.mxu0 }
 0x7ba   : > { %v1435_v63 = vadd.f32 %v2185_v61, %v1434_v62 }
 0x7bc   : > { %v1953_v0 = vmul.f32 -1.442695, %v1435_v63 }
 0x7be   : > { %2209 = vpow2.f32 %v1953_v0 }
 0x7c1   : > { %v1436_v1 = vpop.f32.mrf.mxu0 }
 0x7c4   : > { %v2210_v2 = vpop.eup %2209 }
 0x7c5   : > { %v1441_v3 = vadd.f32 1.0, %v2210_v2 }
 0x7c7   : > { %2211 = vrcp.f32 %v1441_v3  ;;  %v1453_v7 = vand.u32 2147483648, %v1441_v3  ;;  %v1451_v10 = vand.u32 2147483647, %v1441_v3  ;;  %vm1447_vm0 = vweird.f32 %v1441_v3 }
 0x7c9   : > { %v1454_v12 = vor.u32 1.1754944e-38, %v1453_v7  ;;  %vm1452_vm3 = vcmp.eq.f32.partialorder %v1451_v10, 8.507059e+37 }
 0x7cd   : > { %v2212_v4 = vpop.eup %2211 }
 0x7ce   : > { %v1443_v5 = vmul.f32 %v2212_v4, %v1441_v3  ;;  %vm1448_vm15 = vweird.f32 %v2212_v4 }
 0x7cf   : > { %vm1449_vm2 = vmor %vm1447_vm0, %vm1448_vm15 }
 0x7d0   : > { %v1444_v6 = vsub.f32 1.0, %v1443_v5 }
 0x7d2   : > { %v1445_v8 = vmul.f32 %v2212_v4, %v1444_v6 }
 0x7d4   : > { %v1446_v11 = vadd.f32 %v2212_v4, %v1445_v8 }
 0x7d6   : > { %v1450_v13 = vsel %vm1449_vm2, %v2212_v4, %v1446_v11 }
 0x7d7   : > { %v1455_v14 = vsel %vm1452_vm3, %v1454_v12, %v1450_v13 }
 0x7d8   : > { %v1457_v15 = vpack.c.bf16 %v1455_v14, %v1455_v14 }
 0x7da   : > { %1534 = vmatmul.bf16.vlgmr.msra.gmra.mxu1 %v1457_v15 }
 0x857   : > { %v1535_v18 = vpop.f32.mrf.mxu1 }
 0x858   : > { %v1536_v19 = vadd.f32 %v2186_v16, %v1535_v18 }
 0x85a   : > { %v1539_v20 = vadd.f32 %v1536_v19, %v2973_v28 }
 0x85b   : > { %1544 = sbr.rel (%p1986_p3) target bundleno = 2553 (0x9f9), region = 128 }
 0x85c   : > { %1540 = vst.msk [vmem:[#allocation2] sm:$0xff] %vm930_vm1, %v1539_v20 }
 0x85f   : > { %v1537_v21 = vpop.f32.mrf.mxu1 }
 0x860   : > { %vm1547_vm4 = vcmask 261127   ;;  %v2020_v28 = vld [vmem:[%s3180_s17 + $0x8] sm:$0xff]  ;;  %v2019_v29 = vld [vmem:[%s3180_s17] sm:$0xff]  ;;  %v2214_v41 = vld [vmem:[#allocation12] ss:$0 sm:$0xff] }
 0x861   : > { %v1548_v22 = vsel %vm1547_vm4, %v1539_v20, 0.0  ;;  %1608 = vmatpush.bf16.msra.mxu0 %v2020_v28  ;;  %v2213_v38 = vld [vmem:[%s3181_s19] ss:$0 sm:$0xff] }
 0x862   : > { %1549 = vadd.xlane.f32.xlu0 %v1548_v22 }
 0x865   : > { %1609 = vmatpush.bf16.msra.mxu0 %v2019_v29 }
 0x8d5   : > { %v1550_v23 = vpop.xlane.xlu0 %1549 }
 0x8d6   : > { %v1551_v24 = vmul.f32 %v1550_v23, %v2905_v17 }
 0x8d8   : > { %v1552_v25 = vsub.f32 %v1539_v20, %v1551_v24 }
 0x8da   : > { %v1553_v26 = vmul.f32 %v1552_v25, %v1552_v25 }
 0x8dc   : > { %v1554_v27 = vsel %vm1547_vm4, %v1553_v26, 0.0 }
 0x8dd   : > { %1555 = vadd.xlane.f32.xlu0 %v1554_v27 }
 0x950   : > { %v1556_v30 = vpop.xlane.xlu0 %1555 }
 0x951   : > { %v1557_v31 = vmul.f32 %v1556_v30, %v2905_v17 }
 0x953   : > { %v1558_v32 = vadd.f32 1e-05, %v1557_v31 }
 0x955   : > { %2215 = vrsqrt.f32 %v1558_v32  ;;  %vm1565_vm6 = vweird.f32 %v1558_v32 }
 0x95b   : > { %v2216_v33 = vpop.eup %2215 }
 0x95c   : > { %v1560_v34 = vmul.f32 %v2216_v33, %v1558_v32  ;;  %vm1566_vm5 = vweird.f32 %v2216_v33 }
 0x95d   : > { %vm1567_vm7 = vmor %vm1565_vm6, %vm1566_vm5 }
 0x95e   : > { %v1561_v35 = vmul.f32 %v2216_v33, %v1560_v34 }
 0x960   : > { %v1562_v36 = vmul.f32 0.5, %v1561_v35 }
 0x962   : > { %v1563_v37 = vsub.f32 1.5, %v1562_v36 }
 0x964   : > { %v1564_v9 = vmul.f32 %v2216_v33, %v1563_v37 }
 0x966   : > { %v1568_v39 = vsel %vm1567_vm7, %v2216_v33, %v1564_v9 }
 0x967   : > { %v1569_v40 = vmul.f32 %v1568_v39, %v1552_v25 }
 0x969   : > { %v1573_v17 = vmul.f32 %v2213_v38, %v1569_v40 }
 0x96b   : > { %v1577_v42 = vadd.f32 %v2214_v41, %v1573_v17 }
 0x96d   : > { %v1578_v43 = vpack.c.bf16 %v1577_v42, %v1577_v42 }
 0x96f   : > { %v1584_v44 = vshrl.u32 %v1578_v43, 16 }
 0x971   : > { %v1586_v45 = vrot.slane %v1584_v44, 3 }
 0x973   : > { %1995 = vmatmul.msk.bf16.vlgmr.msra.gmra.mxu0 %vm930_vm1, %v1586_v45 }
 0x9f0   : > { %v1611_v46 = vpop.f32.mrf.mxu0 }
 0x9f1   : > { %1615 = vst [vmem:[%s2895_s24] sm:$0x1] %v1611_v46 }
 0x9f8   : > { %v1613_v47 = vpop.f32.mrf.mxu0 }
 0x9f9 PF: > { %s3182_s9 = sld [smem:[#allocation51_spill]]  ;;  %s1627_s21 = sshll.u32 %s2895_s24, 4  ;;  %s1628_s21 = int_to_ptr.vmem [resolvable:$true] %s1627_s21 }
 0x9fa   : > { %s3184_s10 = sand.u32 1, %s2495_s30  }
 0x9fb   : > { %s1617_s4 = scalar_lea.sflag [#allocation6], %s3184_s10 }
 0x9ff   : > { %s1625_s5 = scalar_lea.hbm %s3182_s9, %s2519_s23  ;;  %s2417_s13 = scalar_lea.hbm %s3182_s9, 2 }
 0xa00   : > { %s1629_s27 = sshll.u32 %s1625_s5, 4  ;;  %s1630_s27 = int_to_ptr.hbm [resolvable:$true] %s1629_s27 }
 0xa01   : > { %s2411_s29 = sshra.s32 %s1630_s27, 4  ;;  %s2412_s29 = int_to_ptr.hbm [resolvable:$true] %s2411_s29 }
 0xa02   : > { %s2413_s14 = scalar_lea.hbm %s2412_s29, 1  ;;  %p2418_p6 = scmp.lt.s32.totalorder %s2412_s29, %s3182_s9 }
 0xa03   : > { %p2414_p2 = scmp.ne.s32.totalorder %s2412_s29, %s2413_s14  ;;  %p2419_p8 = scmp.lt.s32.totalorder %s2417_s13, %s2413_s14 }
 0xa05   : > { %p2415_p4 = pnand %p2414_p2, %p2715_p7  ;;  %p2420_p10 = por %p2419_p8, %p2418_p6 }
 0xa07   : > { %p2416_p5 = pneg %p2415_p4 }
 0xa09   : > { %p2421_p12 = pnand %p2420_p10, %p2416_p5 }
 0xa0b   : > { %2424 = shalt.err (!%p2421_p12)
}
 0xa0c   : > { %2041 = dma.vmem_to_hbm [thread:$0]  (%p2715_p7), %s1628_s21, 16, %s1630_s27, %s1617_s4  }
 0xa0d PF: > { %s3185_s23 = sld [smem:[#allocation25_spill]] }
 0xa0e   : > { %s3186_s24 = sld [smem:[#allocation19_spill]] }
 0xa13   : > { %p2074_p0 = scmp.ge.s32.totalorder %s3185_s23, 2 }
 0xa14   : > { %s1641_s20 = sand.u32 1, %s3186_s24  }
 0xa15   : > { %p2064_p11 = pnand %p2074_p0, %p2720_p9  ;;  %s1642_s3 = scalar_lea.sflag [#allocation6], %s1641_s20 }
 0xa17   : > { %p2065_p13 = pneg %p2064_p11 }
 0xa19   : > { %2486 = dma.done.wait (%p2065_p13), %s1642_s3, 16  }
 0xa1a   : > { %2488 = vsyncadd (%p2065_p13), %s1642_s3, 4294967280  ;;  %s34_s3 = sadd.s32 1, %s3185_s23   ;;  %s3188_s18 = sld [smem:[#allocation20_spill]] }
 0xa1b   : > { %p31_p1 = scmp.ge.s32.totalorder %s34_s3, 6   ;;  %s3189_s20 = sld [smem:[#allocation31_spill]] }
 0xa1c   : > { %s3190_s21 = sld [smem:[#allocation21_spill]]  ;;  %s3197_s0 = smov %s2495_s30 }
 0xa1d   : > { %s3191_s1 = sld [smem:[#allocation22_spill]] }
 0xa1e   : > { %s3192_s22 = sld [smem:[#allocation30_spill]]  ;;  %33 = sbr.rel (!%p31_p1) target bundleno = 30 (0x1e), region = 216 }
 0xa1f   : > { %s3193_s2 = sld [smem:[#allocation23_spill]] }
 0xa20   : > { %s3194_s23 = sld [smem:[#allocation24_spill]]  ;;  %s3198_s30 = smov %s3188_s18 }
 0xa21   : > { %s3195_s24 = sld [smem:[#allocation28_spill]] }
 0xa22   : > { %s3196_s25 = sld [smem:[#allocation29_spill]] }
 0xa23   :  { %1647 = vsyncpa [#allocation5], 1 }
 0xa24   :  { %1649 = vsyncpa [#allocation5 + $0x1], 1 }
 0xa25   :  { %1650 = vsyncpa [#allocation8], 1 }
 0xa26   :  { %1651 = vsyncpa [#allocation6], 1 }
 0xa27   :  { %1653 = vsyncpa [#allocation6 + $0x1], 1 }

</bundles_post_ra>
